<compile_context>
chip_gen: v5e
topology: v5e:2x2
jax: 0.10.0
libtpu: 0.0.40
codegen_flags: <defaults>
</compile_context>

<pallas_src>
import functools

import jax
import jax.numpy as jnp
from jax import lax
from jax.experimental import pallas as pl
from jax.experimental.pallas import tpu as pltpu


_TARGET_TILE_PIXELS = 2048            # 512-2048-lane tiles already hit ~85% of HBM roofline
_VMEM_BLOCK_BUDGET_BYTES = 8 * 1024 * 1024   # fits every generation's *default* scoped VMEM


def _padded_elems(shape):
    """Element count of a VMEM buffer after (8, 128) tile padding of the minor dims."""
    s = (1, 1) + tuple(int(d) for d in shape)
    lead = 1
    for d in s[:-2]:
        lead *= d
    return lead * (-(-s[-2] // 8) * 8) * (-(-s[-1] // 128) * 128)


def _tile_vmem_bytes(th, cin, width, r):
    """f32 VMEM footprint of one grid step: pipelined blocks AND in-kernel temporaries."""
    c_out = cin * r * r
    wr = width * r
    chunk = max(1, 8 // r)
    blocks = (2 * _padded_elems((cin, th, width))            # x block (double buffered)
              + 2 * _padded_elems((cin, th * r, wr))         # fused output block
              + 2 * (_padded_elems((c_out, cin))             # weight / bias / repeat op
                     + _padded_elems((c_out, 1))
                     + _padded_elems((width, wr))))
    temps = ((2 + r * r + r + 2 * chunk * r) * _padded_elems((cin, wr))
             + r * r * _padded_elems((cin, cin)))
    return 4 * (blocks + temps)


def _choose_row_tile(n, cin, h, width, r):
    """Input-row tile height: layout-legal (multiple of 8 or full H), VMEM-safe, and
    small enough to keep the grid pipelined (review: cap tiles, don't fill VMEM)."""
    legal = [d for d in range(1, h + 1) if h % d == 0 and (d % 8 == 0 or d == h)]
    target = max(1, _TARGET_TILE_PIXELS // max(width, 1))
    target = min(target, max(1, (n * h) // 8))     # keep >= ~8 grid steps when possible
    fits = [d for d in legal
            if _tile_vmem_bytes(d, cin, width, r) <= _VMEM_BLOCK_BUDGET_BYTES]
    if not fits:                                   # pathological shapes: smallest legal tile
        fits = [min(legal)]
    under = [d for d in fits if d <= target]
    return max(under) if under else min(fits)


def _fused_upsample_kernel(w_ref, b_ref, rep_ref, x_ref, o_ref, *,
                           cin, r, width, th, chunk):
    # w_ref  : (C*r^2, cin) f32, rows ordered (i, j, c) so each (i, j) slab is contiguous
    # b_ref  : (C*r^2, 1)   f32, same row order
    # rep_ref: (width, width*r) f32 0/1 "repeat" operator (x @ rep)[k, w*r+j] == x[k, w]
    # x_ref  : (cin, th, width)         input rows for this tile
    # o_ref  : (cin, th*r, width*r)     already pixel-shuffled output rows
    wr = width * r
    rep = rep_ref[...]
    lane_mod = lax.broadcasted_iota(jnp.int32, (1, wr), 1) % r      # lane -> sub-pixel j
    hp = lax.Precision.HIGHEST

    # Hoisted, loop-invariant: per-(i, j) weight slabs and per-i lane-interleaved bias.
    w_slabs = [[w_ref[(i * r + j) * cin:(i * r + j + 1) * cin, :] for j in range(r)]
               for i in range(r)]
    bias_rows = []
    for i in range(r):
        bi = b_ref[(i * r) * cin:(i * r + 1) * cin, :]              # j = 0 slab, (cin, 1)
        for j in range(1, r):
            bj = b_ref[(i * r + j) * cin:(i * r + j + 1) * cin, :]
            bi = jnp.where(lane_mod == j, bj, bi)                   # (cin, width*r)
        bias_rows.append(bi)

    def chunk_body(hc, carry):
        h0 = pl.multiple_of(hc * chunk, chunk)
        out_rows = []
        for dh in range(chunk):                                      # static
            x_row = x_ref[:, pl.ds(h0 + dh, 1), :][:, 0, :].astype(jnp.float32)  # (cin, W)
            # Exact pixel replication along lanes: x_wide[k, w*r + j] == x_row[k, w].
            x_wide = jnp.dot(x_row, rep,
                             preferred_element_type=jnp.float32, precision=hp)
            for i in range(r):                                       # static
                acc = jnp.dot(w_slabs[i][0], x_wide,
                              preferred_element_type=jnp.float32, precision=hp)
                for j in range(1, r):                                # static
                    acc_j = jnp.dot(w_slabs[i][j], x_wide,
                                    preferred_element_type=jnp.float32, precision=hp)
                    acc = jnp.where(lane_mod == j, acc_j, acc)       # lane j <- channel (i,j)
                out_rows.append(acc + bias_rows[i])                  # (cin, width*r)
        # chunk*r consecutive, already-shuffled output rows -> one sublane-dense store.
        block = jnp.stack(out_rows, axis=1).astype(o_ref.dtype)      # (cin, chunk*r, W*r)
        row0 = pl.multiple_of(hc * (chunk * r), chunk * r)
        o_ref[:, pl.ds(row0, chunk * r), :] = block
        return carry

    lax.fori_loop(0, th // chunk, chunk_body, 0)


@functools.partial(jax.jit, static_argnames=("scale_factor",))
def learnable_upsample(x, weight, bias, scale_factor):
    """
    x      : (N, C, H, W)
    weight : (C*r^2, C)   -- squeezed 1x1 conv weight (out, in)
    bias   : (C*r^2,)
    returns: (N, C, H*r, W*r)  -- Conv2d(1x1) + PixelShuffle(r), fused.
    """
    n, cin, h, width = x.shape
    r = int(scale_factor)
    c_out = cin * r * r
    assert weight.shape == (c_out, cin) and bias.shape == (c_out,)

    # Reorder conv rows from (c, i, j) to (i, j, c) so each (i, j) slab is contiguous.
    wp = weight.astype(jnp.float32).reshape(cin, r, r, cin).transpose(1, 2, 0, 3)
    wp = wp.reshape(c_out, cin)
    bp = bias.astype(jnp.float32).reshape(cin, r, r).transpose(1, 2, 0).reshape(c_out, 1)
    # 0/1 repeat operator (exact under HIGHEST precision): (x @ rep)[k, w*r+j] = x[k, w].
    rep = (jnp.arange(width * r)[None, :] // r == jnp.arange(width)[:, None])
    rep = rep.astype(jnp.float32)

    th = _choose_row_tile(n, cin, h, width, r)                 # input rows per grid step
    chunk = max(1, 8 // r)                                     # input rows per store group
    while th % chunk:
        chunk -= 1

    grid = (n, h // th)
    itemsize = jnp.dtype(x.dtype).itemsize
    kernel = pl.pallas_call(
        functools.partial(_fused_upsample_kernel,
                          cin=cin, r=r, width=width, th=th, chunk=chunk),
        out_shape=jax.ShapeDtypeStruct((n, cin, h * r, width * r), x.dtype),
        grid_spec=pltpu.PrefetchScalarGridSpec(
            num_scalar_prefetch=0,
            grid=grid,
            in_specs=[
                pl.BlockSpec((c_out, cin), lambda ni, hb: (0, 0)),       # weight (resident)
                pl.BlockSpec((c_out, 1), lambda ni, hb: (0, 0)),         # bias   (resident)
                pl.BlockSpec((width, width * r), lambda ni, hb: (0, 0)),  # repeat (resident)
                pl.BlockSpec((None, cin, th, width),
                             lambda ni, hb: (ni, 0, hb, 0)),             # input rows
            ],
            out_specs=pl.BlockSpec((None, cin, th * r, width * r),
                                   lambda ni, hb: (ni, 0, hb, 0)),        # shuffled rows
        ),
        compiler_params=pltpu.CompilerParams(
            dimension_semantics=("parallel", "parallel"),
        ),
        cost_estimate=pl.CostEstimate(
            flops=2 * n * h * width * r * cin * (width + c_out),
            transcendentals=0,
            bytes_accessed=((n * cin * h * width + n * c_out * h * width) * itemsize
                            + (c_out * cin + c_out + width * width * r) * 4),
        ),
    )
    # Output is already the final (N, C, H*r, W*r) layout: no post-kernel shuffle pass.
    return kernel(wp, bp, rep, x)


def _reference(x, weight, bias, r):
    # Pure-JAX reference (conv1x1 + pixel shuffle), full f32.
    n, c, h, w = x.shape
    y = jnp.einsum("nchw,oc->nohw", x, weight,
                   precision=lax.Precision.HIGHEST) + bias[None, :, None, None]
    y = y.reshape(n, c, r, r, h, w)
    y = jnp.transpose(y, (0, 1, 4, 2, 5, 3))         # (N, C, H, r, W, r)
    return y.reshape(n, c, h * r, w * r)


if __name__ == "__main__":
    key = jax.random.PRNGKey(0)
    k_x, k_w, k_b = jax.random.split(key, 3)

    N, C, H, W = 2, 4, 16, 16
    r = 2
    C_out = C * r * r

    x = jax.random.normal(k_x, (N, C, H, W), dtype=jnp.float32)
    # Deterministic synthetic parameters (Conv2d weight (C_out, C, 1, 1) squeezed).
    weight = jax.random.normal(k_w, (C_out, C), dtype=jnp.float32) * 0.1
    bias = jax.random.normal(k_b, (C_out,), dtype=jnp.float32) * 0.1

    out = learnable_upsample(x, weight, bias, scale_factor=r)
    out = jax.block_until_ready(out)

    ref = _reference(x, weight, bias, r)
    assert out.shape == (N, C, H * r, W * r)
    # Full-f32 path (HIGHEST-precision matmuls) -> tight tolerance.
    assert jnp.allclose(out, ref, atol=1e-4, rtol=1e-4), float(jnp.max(jnp.abs(out - ref)))

    print("KERNEL_OK")
</pallas_src>

<mosaic_0001>
module attributes {stable_mosaic.version = 11 : i64} {
  func.func @_fused_upsample_kernel(%arg0: i32, %arg1: i32, %arg2: memref<16x4xf32, #tpu.memory_space<vmem>>, %arg3: memref<16x1xf32, #tpu.memory_space<vmem>>, %arg4: memref<16x32xf32, #tpu.memory_space<vmem>>, %arg5: memref<1x4x8x16xf32, #tpu.memory_space<vmem>>, %arg6: memref<1x4x16x32xf32, #tpu.memory_space<vmem>>) attributes {dimension_semantics = [#tpu.dimension_semantics<parallel>, #tpu.dimension_semantics<parallel>], iteration_bounds = array<i64: 2, 2>, scalar_prefetch = 0 : i64, scratch_operands = 0 : i64, tpu.core_type = #tpu.core_type<tc>, window_params = [{pipeline_mode = #tpu.pipeline_mode<synchronous>, transform_indices = @transform_0, window_bounds = array<i64: 16, 4>}, {pipeline_mode = #tpu.pipeline_mode<synchronous>, transform_indices = @transform_1, window_bounds = array<i64: 16, 1>}, {pipeline_mode = #tpu.pipeline_mode<synchronous>, transform_indices = @transform_2, window_bounds = array<i64: 16, 32>}, {transform_indices = @transform_3, window_bounds = array<i64: 1, 4, 8, 16>}, {transform_indices = @transform_4, window_bounds = array<i64: 1, 4, 16, 32>}]} {
    %c0 = arith.constant 0 : index
    %c0_0 = arith.constant 0 : index
    %0 = vector.load %arg4[%c0, %c0_0] : memref<16x32xf32, #tpu.memory_space<vmem>>, vector<16x32xf32>
    %1 = tpu.iota {dimensions = array<i32: 1>} : vector<1x32xi32>
    %c2_i32 = arith.constant 2 : i32
    %c0_i32 = arith.constant 0 : i32
    %2 = arith.cmpi eq, %c2_i32, %c0_i32 : i32
    %c1_i32 = arith.constant 1 : i32
    %3 = arith.select %2, %c1_i32, %c2_i32 : i32
    %4 = vector.broadcast %3 : i32 to vector<1x32xi32>
    %5 = arith.remsi %1, %4 : vector<1x32xi32>
    %c0_i32_1 = arith.constant 0 : i32
    %6 = vector.broadcast %c0_i32_1 : i32 to vector<1x32xi32>
    %7 = arith.cmpi ne, %5, %6 : vector<1x32xi32>
    %c0_i32_2 = arith.constant 0 : i32
    %8 = vector.broadcast %c0_i32_2 : i32 to vector<1x32xi32>
    %9 = arith.cmpi slt, %5, %8 : vector<1x32xi32>
    %c0_i32_3 = arith.constant 0 : i32
    %10 = arith.cmpi slt, %3, %c0_i32_3 : i32
    %11 = vector.broadcast %10 : i1 to vector<1x32xi1>
    %12 = vector.broadcast %11 : vector<1x32xi1> to vector<1x32xi1>
    %13 = arith.xori %9, %12 : vector<1x32xi1>
    %14 = arith.andi %13, %7 : vector<1x32xi1>
    %15 = vector.broadcast %3 : i32 to vector<1x32xi32>
    %16 = arith.addi %5, %15 : vector<1x32xi32>
    %17 = arith.select %14, %16, %5 : vector<1x32xi1>, vector<1x32xi32>
    %c0_4 = arith.constant 0 : index
    %c0_5 = arith.constant 0 : index
    %18 = vector.load %arg2[%c0_4, %c0_5] : memref<16x4xf32, #tpu.memory_space<vmem>>, vector<4x4xf32>
    %c4 = arith.constant 4 : index
    %c0_6 = arith.constant 0 : index
    %19 = vector.load %arg2[%c4, %c0_6] : memref<16x4xf32, #tpu.memory_space<vmem>>, vector<4x4xf32>
    %c8 = arith.constant 8 : index
    %c0_7 = arith.constant 0 : index
    %20 = vector.load %arg2[%c8, %c0_7] : memref<16x4xf32, #tpu.memory_space<vmem>>, vector<4x4xf32>
    %c12 = arith.constant 12 : index
    %c0_8 = arith.constant 0 : index
    %21 = vector.load %arg2[%c12, %c0_8] : memref<16x4xf32, #tpu.memory_space<vmem>>, vector<4x4xf32>
    %c0_9 = arith.constant 0 : index
    %c0_10 = arith.constant 0 : index
    %22 = vector.load %arg3[%c0_9, %c0_10] : memref<16x1xf32, #tpu.memory_space<vmem>>, vector<4x1xf32>
    %c4_11 = arith.constant 4 : index
    %c0_12 = arith.constant 0 : index
    %23 = vector.load %arg3[%c4_11, %c0_12] : memref<16x1xf32, #tpu.memory_space<vmem>>, vector<4x1xf32>
    %c1_i32_13 = arith.constant 1 : i32
    %24 = vector.broadcast %c1_i32_13 : i32 to vector<1x32xi32>
    %25 = arith.cmpi eq, %17, %24 : vector<1x32xi32>
    %26 = vector.shape_cast %25 : vector<1x32xi1> to vector<1x32xi1>
    %27 = vector.broadcast %26 : vector<1x32xi1> to vector<4x32xi1>
    %28 = vector.shape_cast %23 : vector<4x1xf32> to vector<4x1xf32>
    %29 = vector.broadcast %28 : vector<4x1xf32> to vector<4x32xf32>
    %30 = vector.shape_cast %22 : vector<4x1xf32> to vector<4x1xf32>
    %31 = vector.broadcast %30 : vector<4x1xf32> to vector<4x32xf32>
    %32 = arith.select %27, %29, %31 : vector<4x32xi1>, vector<4x32xf32>
    %c8_14 = arith.constant 8 : index
    %c0_15 = arith.constant 0 : index
    %33 = vector.load %arg3[%c8_14, %c0_15] : memref<16x1xf32, #tpu.memory_space<vmem>>, vector<4x1xf32>
    %c12_16 = arith.constant 12 : index
    %c0_17 = arith.constant 0 : index
    %34 = vector.load %arg3[%c12_16, %c0_17] : memref<16x1xf32, #tpu.memory_space<vmem>>, vector<4x1xf32>
    %c1_i32_18 = arith.constant 1 : i32
    %35 = vector.broadcast %c1_i32_18 : i32 to vector<1x32xi32>
    %36 = arith.cmpi eq, %17, %35 : vector<1x32xi32>
    %37 = vector.shape_cast %36 : vector<1x32xi1> to vector<1x32xi1>
    %38 = vector.broadcast %37 : vector<1x32xi1> to vector<4x32xi1>
    %39 = vector.shape_cast %34 : vector<4x1xf32> to vector<4x1xf32>
    %40 = vector.broadcast %39 : vector<4x1xf32> to vector<4x32xf32>
    %41 = vector.shape_cast %33 : vector<4x1xf32> to vector<4x1xf32>
    %42 = vector.broadcast %41 : vector<4x1xf32> to vector<4x32xf32>
    %43 = arith.select %38, %40, %42 : vector<4x32xi1>, vector<4x32xf32>
    %c0_i32_19 = arith.constant 0 : i32
    %c2_i32_20 = arith.constant 2 : i32
    %44 = arith.addi %c0_i32_19, %c2_i32_20 : i32
    %c1_i32_21 = arith.constant 1 : i32
    scf.for %arg7 = %c0_i32_19 to %44 step %c1_i32_21  : i32 {
      %c4_i32 = arith.constant 4 : i32
      %45 = arith.muli %arg7, %c4_i32 : i32
      %46 = tpu.assume_multiple %45, 4 : i32
      %c0_i32_23 = arith.constant 0 : i32
      %47 = arith.addi %46, %c0_i32_23 : i32
      %c0_24 = arith.constant 0 : index
      %c0_25 = arith.constant 0 : index
      %48 = arith.index_cast %47 : i32 to index
      %c0_26 = arith.constant 0 : index
      %49 = vector.load %arg5[%c0_24, %c0_25, %48, %c0_26] : memref<1x4x8x16xf32, #tpu.memory_space<vmem>>, vector<1x4x1x16xf32>
      %50 = vector.shape_cast %49 : vector<1x4x1x16xf32> to vector<4x1x16xf32>
      %51 = vector.shape_cast %50 : vector<4x1x16xf32> to vector<4x16xf32>
      %cst = arith.constant dense<0.000000e+00> : vector<4x32xf32>
      %52 = tpu.matmul %51, %0, %cst {dimension_numbers = #tpu.dot_dimension_numbers<[1], [0], [0], [1], [0, 0, 1, 1], [], []>, precision = #tpu.contract_precision<fp32>} : vector<4x16xf32>, vector<16x32xf32>, vector<4x32xf32> -> vector<4x32xf32>
      %cst_27 = arith.constant dense<0.000000e+00> : vector<4x32xf32>
      %53 = tpu.matmul %18, %52, %cst_27 {dimension_numbers = #tpu.dot_dimension_numbers<[1], [0], [0], [1], [0, 0, 1, 1], [], []>, precision = #tpu.contract_precision<fp32>} : vector<4x4xf32>, vector<4x32xf32>, vector<4x32xf32> -> vector<4x32xf32>
      %cst_28 = arith.constant dense<0.000000e+00> : vector<4x32xf32>
      %54 = tpu.matmul %19, %52, %cst_28 {dimension_numbers = #tpu.dot_dimension_numbers<[1], [0], [0], [1], [0, 0, 1, 1], [], []>, precision = #tpu.contract_precision<fp32>} : vector<4x4xf32>, vector<4x32xf32>, vector<4x32xf32> -> vector<4x32xf32>
      %c1_i32_29 = arith.constant 1 : i32
      %55 = vector.broadcast %c1_i32_29 : i32 to vector<1x32xi32>
      %56 = arith.cmpi eq, %17, %55 : vector<1x32xi32>
      %57 = vector.shape_cast %56 : vector<1x32xi1> to vector<1x32xi1>
      %58 = vector.broadcast %57 : vector<1x32xi1> to vector<4x32xi1>
      %59 = arith.select %58, %54, %53 : vector<4x32xi1>, vector<4x32xf32>
      %60 = arith.addf %59, %32 : vector<4x32xf32>
      %cst_30 = arith.constant dense<0.000000e+00> : vector<4x32xf32>
      %61 = tpu.matmul %20, %52, %cst_30 {dimension_numbers = #tpu.dot_dimension_numbers<[1], [0], [0], [1], [0, 0, 1, 1], [], []>, precision = #tpu.contract_precision<fp32>} : vector<4x4xf32>, vector<4x32xf32>, vector<4x32xf32> -> vector<4x32xf32>
      %cst_31 = arith.constant dense<0.000000e+00> : vector<4x32xf32>
      %62 = tpu.matmul %21, %52, %cst_31 {dimension_numbers = #tpu.dot_dimension_numbers<[1], [0], [0], [1], [0, 0, 1, 1], [], []>, precision = #tpu.contract_precision<fp32>} : vector<4x4xf32>, vector<4x32xf32>, vector<4x32xf32> -> vector<4x32xf32>
      %c1_i32_32 = arith.constant 1 : i32
      %63 = vector.broadcast %c1_i32_32 : i32 to vector<1x32xi32>
      %64 = arith.cmpi eq, %17, %63 : vector<1x32xi32>
      %65 = vector.shape_cast %64 : vector<1x32xi1> to vector<1x32xi1>
      %66 = vector.broadcast %65 : vector<1x32xi1> to vector<4x32xi1>
      %67 = arith.select %66, %62, %61 : vector<4x32xi1>, vector<4x32xf32>
      %68 = arith.addf %67, %43 : vector<4x32xf32>
      %c1_i32_33 = arith.constant 1 : i32
      %69 = arith.addi %46, %c1_i32_33 : i32
      %c0_34 = arith.constant 0 : index
      %c0_35 = arith.constant 0 : index
      %70 = arith.index_cast %69 : i32 to index
      %c0_36 = arith.constant 0 : index
      %71 = vector.load %arg5[%c0_34, %c0_35, %70, %c0_36] : memref<1x4x8x16xf32, #tpu.memory_space<vmem>>, vector<1x4x1x16xf32>
      %72 = vector.shape_cast %71 : vector<1x4x1x16xf32> to vector<4x1x16xf32>
      %73 = vector.shape_cast %72 : vector<4x1x16xf32> to vector<4x16xf32>
      %cst_37 = arith.constant dense<0.000000e+00> : vector<4x32xf32>
      %74 = tpu.matmul %73, %0, %cst_37 {dimension_numbers = #tpu.dot_dimension_numbers<[1], [0], [0], [1], [0, 0, 1, 1], [], []>, precision = #tpu.contract_precision<fp32>} : vector<4x16xf32>, vector<16x32xf32>, vector<4x32xf32> -> vector<4x32xf32>
      %cst_38 = arith.constant dense<0.000000e+00> : vector<4x32xf32>
      %75 = tpu.matmul %18, %74, %cst_38 {dimension_numbers = #tpu.dot_dimension_numbers<[1], [0], [0], [1], [0, 0, 1, 1], [], []>, precision = #tpu.contract_precision<fp32>} : vector<4x4xf32>, vector<4x32xf32>, vector<4x32xf32> -> vector<4x32xf32>
      %cst_39 = arith.constant dense<0.000000e+00> : vector<4x32xf32>
      %76 = tpu.matmul %19, %74, %cst_39 {dimension_numbers = #tpu.dot_dimension_numbers<[1], [0], [0], [1], [0, 0, 1, 1], [], []>, precision = #tpu.contract_precision<fp32>} : vector<4x4xf32>, vector<4x32xf32>, vector<4x32xf32> -> vector<4x32xf32>
      %c1_i32_40 = arith.constant 1 : i32
      %77 = vector.broadcast %c1_i32_40 : i32 to vector<1x32xi32>
      %78 = arith.cmpi eq, %17, %77 : vector<1x32xi32>
      %79 = vector.shape_cast %78 : vector<1x32xi1> to vector<1x32xi1>
      %80 = vector.broadcast %79 : vector<1x32xi1> to vector<4x32xi1>
      %81 = arith.select %80, %76, %75 : vector<4x32xi1>, vector<4x32xf32>
      %82 = arith.addf %81, %32 : vector<4x32xf32>
      %cst_41 = arith.constant dense<0.000000e+00> : vector<4x32xf32>
      %83 = tpu.matmul %20, %74, %cst_41 {dimension_numbers = #tpu.dot_dimension_numbers<[1], [0], [0], [1], [0, 0, 1, 1], [], []>, precision = #tpu.contract_precision<fp32>} : vector<4x4xf32>, vector<4x32xf32>, vector<4x32xf32> -> vector<4x32xf32>
      %cst_42 = arith.constant dense<0.000000e+00> : vector<4x32xf32>
      %84 = tpu.matmul %21, %74, %cst_42 {dimension_numbers = #tpu.dot_dimension_numbers<[1], [0], [0], [1], [0, 0, 1, 1], [], []>, precision = #tpu.contract_precision<fp32>} : vector<4x4xf32>, vector<4x32xf32>, vector<4x32xf32> -> vector<4x32xf32>
      %c1_i32_43 = arith.constant 1 : i32
      %85 = vector.broadcast %c1_i32_43 : i32 to vector<1x32xi32>
      %86 = arith.cmpi eq, %17, %85 : vector<1x32xi32>
      %87 = vector.shape_cast %86 : vector<1x32xi1> to vector<1x32xi1>
      %88 = vector.broadcast %87 : vector<1x32xi1> to vector<4x32xi1>
      %89 = arith.select %88, %84, %83 : vector<4x32xi1>, vector<4x32xf32>
      %90 = arith.addf %89, %43 : vector<4x32xf32>
      %c2_i32_44 = arith.constant 2 : i32
      %91 = arith.addi %46, %c2_i32_44 : i32
      %c0_45 = arith.constant 0 : index
      %c0_46 = arith.constant 0 : index
      %92 = arith.index_cast %91 : i32 to index
      %c0_47 = arith.constant 0 : index
      %93 = vector.load %arg5[%c0_45, %c0_46, %92, %c0_47] : memref<1x4x8x16xf32, #tpu.memory_space<vmem>>, vector<1x4x1x16xf32>
      %94 = vector.shape_cast %93 : vector<1x4x1x16xf32> to vector<4x1x16xf32>
      %95 = vector.shape_cast %94 : vector<4x1x16xf32> to vector<4x16xf32>
      %cst_48 = arith.constant dense<0.000000e+00> : vector<4x32xf32>
      %96 = tpu.matmul %95, %0, %cst_48 {dimension_numbers = #tpu.dot_dimension_numbers<[1], [0], [0], [1], [0, 0, 1, 1], [], []>, precision = #tpu.contract_precision<fp32>} : vector<4x16xf32>, vector<16x32xf32>, vector<4x32xf32> -> vector<4x32xf32>
      %cst_49 = arith.constant dense<0.000000e+00> : vector<4x32xf32>
      %97 = tpu.matmul %18, %96, %cst_49 {dimension_numbers = #tpu.dot_dimension_numbers<[1], [0], [0], [1], [0, 0, 1, 1], [], []>, precision = #tpu.contract_precision<fp32>} : vector<4x4xf32>, vector<4x32xf32>, vector<4x32xf32> -> vector<4x32xf32>
      %cst_50 = arith.constant dense<0.000000e+00> : vector<4x32xf32>
      %98 = tpu.matmul %19, %96, %cst_50 {dimension_numbers = #tpu.dot_dimension_numbers<[1], [0], [0], [1], [0, 0, 1, 1], [], []>, precision = #tpu.contract_precision<fp32>} : vector<4x4xf32>, vector<4x32xf32>, vector<4x32xf32> -> vector<4x32xf32>
      %c1_i32_51 = arith.constant 1 : i32
      %99 = vector.broadcast %c1_i32_51 : i32 to vector<1x32xi32>
      %100 = arith.cmpi eq, %17, %99 : vector<1x32xi32>
      %101 = vector.shape_cast %100 : vector<1x32xi1> to vector<1x32xi1>
      %102 = vector.broadcast %101 : vector<1x32xi1> to vector<4x32xi1>
      %103 = arith.select %102, %98, %97 : vector<4x32xi1>, vector<4x32xf32>
      %104 = arith.addf %103, %32 : vector<4x32xf32>
      %cst_52 = arith.constant dense<0.000000e+00> : vector<4x32xf32>
      %105 = tpu.matmul %20, %96, %cst_52 {dimension_numbers = #tpu.dot_dimension_numbers<[1], [0], [0], [1], [0, 0, 1, 1], [], []>, precision = #tpu.contract_precision<fp32>} : vector<4x4xf32>, vector<4x32xf32>, vector<4x32xf32> -> vector<4x32xf32>
      %cst_53 = arith.constant dense<0.000000e+00> : vector<4x32xf32>
      %106 = tpu.matmul %21, %96, %cst_53 {dimension_numbers = #tpu.dot_dimension_numbers<[1], [0], [0], [1], [0, 0, 1, 1], [], []>, precision = #tpu.contract_precision<fp32>} : vector<4x4xf32>, vector<4x32xf32>, vector<4x32xf32> -> vector<4x32xf32>
      %c1_i32_54 = arith.constant 1 : i32
      %107 = vector.broadcast %c1_i32_54 : i32 to vector<1x32xi32>
      %108 = arith.cmpi eq, %17, %107 : vector<1x32xi32>
      %109 = vector.shape_cast %108 : vector<1x32xi1> to vector<1x32xi1>
      %110 = vector.broadcast %109 : vector<1x32xi1> to vector<4x32xi1>
      %111 = arith.select %110, %106, %105 : vector<4x32xi1>, vector<4x32xf32>
      %112 = arith.addf %111, %43 : vector<4x32xf32>
      %c3_i32 = arith.constant 3 : i32
      %113 = arith.addi %46, %c3_i32 : i32
      %c0_55 = arith.constant 0 : index
      %c0_56 = arith.constant 0 : index
      %114 = arith.index_cast %113 : i32 to index
      %c0_57 = arith.constant 0 : index
      %115 = vector.load %arg5[%c0_55, %c0_56, %114, %c0_57] : memref<1x4x8x16xf32, #tpu.memory_space<vmem>>, vector<1x4x1x16xf32>
      %116 = vector.shape_cast %115 : vector<1x4x1x16xf32> to vector<4x1x16xf32>
      %117 = vector.shape_cast %116 : vector<4x1x16xf32> to vector<4x16xf32>
      %cst_58 = arith.constant dense<0.000000e+00> : vector<4x32xf32>
      %118 = tpu.matmul %117, %0, %cst_58 {dimension_numbers = #tpu.dot_dimension_numbers<[1], [0], [0], [1], [0, 0, 1, 1], [], []>, precision = #tpu.contract_precision<fp32>} : vector<4x16xf32>, vector<16x32xf32>, vector<4x32xf32> -> vector<4x32xf32>
      %cst_59 = arith.constant dense<0.000000e+00> : vector<4x32xf32>
      %119 = tpu.matmul %18, %118, %cst_59 {dimension_numbers = #tpu.dot_dimension_numbers<[1], [0], [0], [1], [0, 0, 1, 1], [], []>, precision = #tpu.contract_precision<fp32>} : vector<4x4xf32>, vector<4x32xf32>, vector<4x32xf32> -> vector<4x32xf32>
      %cst_60 = arith.constant dense<0.000000e+00> : vector<4x32xf32>
      %120 = tpu.matmul %19, %118, %cst_60 {dimension_numbers = #tpu.dot_dimension_numbers<[1], [0], [0], [1], [0, 0, 1, 1], [], []>, precision = #tpu.contract_precision<fp32>} : vector<4x4xf32>, vector<4x32xf32>, vector<4x32xf32> -> vector<4x32xf32>
      %c1_i32_61 = arith.constant 1 : i32
      %121 = vector.broadcast %c1_i32_61 : i32 to vector<1x32xi32>
      %122 = arith.cmpi eq, %17, %121 : vector<1x32xi32>
      %123 = vector.shape_cast %122 : vector<1x32xi1> to vector<1x32xi1>
      %124 = vector.broadcast %123 : vector<1x32xi1> to vector<4x32xi1>
      %125 = arith.select %124, %120, %119 : vector<4x32xi1>, vector<4x32xf32>
      %126 = arith.addf %125, %32 : vector<4x32xf32>
      %cst_62 = arith.constant dense<0.000000e+00> : vector<4x32xf32>
      %127 = tpu.matmul %20, %118, %cst_62 {dimension_numbers = #tpu.dot_dimension_numbers<[1], [0], [0], [1], [0, 0, 1, 1], [], []>, precision = #tpu.contract_precision<fp32>} : vector<4x4xf32>, vector<4x32xf32>, vector<4x32xf32> -> vector<4x32xf32>
      %cst_63 = arith.constant dense<0.000000e+00> : vector<4x32xf32>
      %128 = tpu.matmul %21, %118, %cst_63 {dimension_numbers = #tpu.dot_dimension_numbers<[1], [0], [0], [1], [0, 0, 1, 1], [], []>, precision = #tpu.contract_precision<fp32>} : vector<4x4xf32>, vector<4x32xf32>, vector<4x32xf32> -> vector<4x32xf32>
      %c1_i32_64 = arith.constant 1 : i32
      %129 = vector.broadcast %c1_i32_64 : i32 to vector<1x32xi32>
      %130 = arith.cmpi eq, %17, %129 : vector<1x32xi32>
      %131 = vector.shape_cast %130 : vector<1x32xi1> to vector<1x32xi1>
      %132 = vector.broadcast %131 : vector<1x32xi1> to vector<4x32xi1>
      %133 = arith.select %132, %128, %127 : vector<4x32xi1>, vector<4x32xf32>
      %134 = arith.addf %133, %43 : vector<4x32xf32>
      %135 = vector.shape_cast %60 : vector<4x32xf32> to vector<4x1x32xf32>
      %136 = vector.shape_cast %68 : vector<4x32xf32> to vector<4x1x32xf32>
      %137 = vector.shape_cast %82 : vector<4x32xf32> to vector<4x1x32xf32>
      %138 = vector.shape_cast %90 : vector<4x32xf32> to vector<4x1x32xf32>
      %139 = vector.shape_cast %104 : vector<4x32xf32> to vector<4x1x32xf32>
      %140 = vector.shape_cast %112 : vector<4x32xf32> to vector<4x1x32xf32>
      %141 = vector.shape_cast %126 : vector<4x32xf32> to vector<4x1x32xf32>
      %142 = vector.shape_cast %134 : vector<4x32xf32> to vector<4x1x32xf32>
      %143 = tpu.concatenate %135, %136, %137, %138, %139, %140, %141, %142 in 1 : vector<4x1x32xf32>, vector<4x1x32xf32>, vector<4x1x32xf32>, vector<4x1x32xf32>, vector<4x1x32xf32>, vector<4x1x32xf32>, vector<4x1x32xf32>, vector<4x1x32xf32> -> vector<4x8x32xf32>
      %c8_i32 = arith.constant 8 : i32
      %144 = arith.muli %arg7, %c8_i32 : i32
      %145 = tpu.assume_multiple %144, 8 : i32
      %c0_65 = arith.constant 0 : index
      %c0_66 = arith.constant 0 : index
      %146 = arith.index_cast %145 : i32 to index
      %c0_67 = arith.constant 0 : index
      %147 = vector.load %arg6[%c0_65, %c0_66, %146, %c0_67] : memref<1x4x16x32xf32, #tpu.memory_space<vmem>>, vector<1x4x8x32xf32>
      %148 = vector.shape_cast %147 : vector<1x4x8x32xf32> to vector<4x8x32xf32>
      %149 = vector.shape_cast %143 : vector<4x8x32xf32> to vector<1x4x8x32xf32>
      tpu.vector_store %arg6[%c0_65, %c0_66, %146, %c0_67], %149 {strides = array<i32>} : memref<1x4x16x32xf32, #tpu.memory_space<vmem>>, vector<1x4x8x32xf32>,
    }
    %c2_i32_22 = arith.constant 2 : i32
    return
  }
  func.func @transform_0(%arg0: i32, %arg1: i32) -> (i32, i32) {
    %c0_i32 = arith.constant 0 : i32
    %c0_i32_0 = arith.constant 0 : i32
    %c0_i32_1 = arith.constant 0 : i32
    return %c0_i32, %c0_i32_0 : i32, i32
  }
  func.func @transform_1(%arg0: i32, %arg1: i32) -> (i32, i32) {
    %c0_i32 = arith.constant 0 : i32
    %c0_i32_0 = arith.constant 0 : i32
    %c0_i32_1 = arith.constant 0 : i32
    return %c0_i32, %c0_i32_0 : i32, i32
  }
  func.func @transform_2(%arg0: i32, %arg1: i32) -> (i32, i32) {
    %c0_i32 = arith.constant 0 : i32
    %c0_i32_0 = arith.constant 0 : i32
    %c0_i32_1 = arith.constant 0 : i32
    return %c0_i32, %c0_i32_0 : i32, i32
  }
  func.func @transform_3(%arg0: i32, %arg1: i32) -> (i32, i32, i32, i32) {
    %c0_i32 = arith.constant 0 : i32
    %c0_i32_0 = arith.constant 0 : i32
    %c0_i32_1 = arith.constant 0 : i32
    return %arg0, %c0_i32, %arg1, %c0_i32_0 : i32, i32, i32, i32
  }
  func.func @transform_4(%arg0: i32, %arg1: i32) -> (i32, i32, i32, i32) {
    %c0_i32 = arith.constant 0 : i32
    %c0_i32_0 = arith.constant 0 : i32
    %c0_i32_1 = arith.constant 0 : i32
    return %arg0, %c0_i32, %arg1, %c0_i32_0 : i32, i32, i32, i32
  }
}

</mosaic_0001>

<bundles_post_ra>
// kernel: learnable_upsample.1
= control target key start
LH: loop header
LB: loop body
LE: loop exit
PB: predicated region body
PF: predicated region fallthrough
CT: control target
= control target key end

     0   :  { %9 = vsyncpa [#allocation3], 0  ;;  %s4581_s0 = inlined_call_operand.vmem [shape: f32[16,4], index: 0, kind: input, shape index: {}]   ;;  %s4582_s1 = inlined_call_operand.vmem [shape: f32[16,1], index: 1, kind: input, shape index: {}]   ;;  %s4583_s2 = inlined_call_operand.vmem [shape: f32[16,32], index: 2, kind: input, shape index: {}]   ;;  %s4584_s3 = inlined_call_operand.hbm [shape: f32[2,4,16,16], index: 3, kind: input, shape index: {}]   ;;  %s4585_s4 = inlined_call_operand.hbm [shape: f32[2,4,32,32], index: 4, kind: output, shape index: {}]  }
   0x1   :  { %11 = vsyncpa [#allocation3 + $0x1], 0 }
   0x2   :  { %12 = vsyncpa [#allocation4], 0 }
   0x3   :  { %14 = vsyncpa [#allocation4 + $0x1], 0  ;;  %s3945_s15 = smov 0   ;;  %s3947_s16 = smov 0  }
   0x4   :  { %s3949_s17 = smov 0   ;;  %s3951_s18 = smov 0  }
   0x5   :  { %s3953_s19 = smov 0   ;;  %s3955_s20 = smov 0  }
   0x6   :  { %s3957_s21 = smov 0   ;;  %s3959_s22 = smov 0  }
   0x7 LB: > { %4593 = sst [smem:[#allocation10_spill]] %s3883_s17  ;;  %s3661_s23 = sadd.s32 4294967295, %s3903_s22   ;;  %s3903_s22 = sphi %s3959_s22, %s20_s22   ;;  %s3899_s21 = sphi %s3957_s21, %s4628_s21   ;;  %s3895_s20 = sphi %s3955_s20, %s4627_s20   ;;  %s3891_s19 = sphi %s3953_s19, %s4626_s19   ;;  %s3887_s18 = sphi %s3951_s18, %s4625_s18   ;;  %s3883_s17 = sphi %s3949_s17, %s4620_s17   ;;  %s3879_s16 = sphi %s3947_s16, %s4624_s16   ;;  %s3875_s15 = sphi %s3945_s15, %s4623_s15  }
   0x8   : > { %s3662_s24 = sadd.s32 4294967294, %s3903_s22   ;;  %s29_s25 = sadd.s32 1, %s3895_s20 }
   0x9   : > { %s32_s26 = sadd.s32 1, %s3899_s21  ;;  %p30_p0 = scmp.ge.s32.totalorder %s29_s25, 2 }
   0xa   : > { %s104_s27 = sadd.s32 1, %s3883_s17  ;;  %p111_p1 = scmp.ne.s32.totalorder %s3883_s17, %s3879_s16 }
   0xb   : > { %p112_p2 = scmp.eq.s32.totalorder %s3903_s22, 0  ;;  %s4630_s25 = smov (%p30_p0, %s29_s25), 0 }
   0xc   : > { %4594 = sst [smem:[#allocation11_spill]] %s4630_s25  ;;  %s4632_s26 = smov (!%p30_p0, %s32_s26), %s3899_s21 }
   0xd   : > { %s100_s28 = ssub.s32 %s3895_s20, %s4630_s25  ;;  %p3998_p3 = por %p112_p2, %p111_p1 }
   0xe   : > { %p34_p4 = scmp.ge.s32.totalorder %s4632_s26, 2  ;;  %p117_p5 = scmp.ne.s32.totalorder %s3879_s16, %s3875_s15 }
   0xf   : > { %p118_p6 = scmp.eq.s32.totalorder %s3661_s23, 0  ;;  %p143_p7 = scmp.eq.s32.totalorder %s3661_s23, 3 }
  0x10   : > { %s4634_s26 = smov (%p34_p4, %s4632_s26), 0  ;;  %p149_p10 = scmp.eq.s32.totalorder %s3662_s24, 3 }
  0x11   : > { %4596 = sst [smem:[#allocation12_spill]] %s4634_s26  ;;  %p4006_p8 = por %p118_p6, %p117_p5 }
  0x12   : > { %p4010_p9 = por %p143_p7, %p111_p1  ;;  %s99_s6 = ssub.s32 %s3899_s21, %s4634_s26 }
  0x13   : > { %s101_s7 = sor.u32 %s100_s28, %s99_s6  ;;  %p4016_p12 = por %p149_p10, %p117_p5 }
  0x14   : > { %p102_p11 = scmp.eq.s32.totalorder %s101_s7, 0  ;;  %p3712_p13 = scmp.lt.s32.totalorder %s3903_s22, 4 }
  0x15   : > { %s178_s9 = sand.u32 1, %s3883_s17   ;;  %s3666_s12 = sshll.u32 %s3899_s21, 3 }
  0x16   : > { %s4023_s10 = scalar_select %p102_p11, %s3883_s17, %s104_s27  }
  0x17   : > { %s3665_s11 = sshll.u32 %s178_s9, 5  ;;  %s186_s13 = sadd.s32 %s3895_s20, %s3666_s12 }
  0x18   : > { %4600 = sst [smem:[#allocation13_spill]] %s4023_s10  ;;  %s182_s14 = scalar_lea.vmem [#allocation2], %s3665_s11 }
  0x19   : > { %s191_s23 = sshll.u32 %s182_s14, 4  ;;  %s3667_s26 = sshll.u32 %s186_s13, 3  ;;  %s192_s23 = int_to_ptr.vmem [resolvable:$true] %s191_s23 }
  0x1a   : > { %s188_s6 = scalar_lea.hbm %s4584_s3, %s3667_s26  ;;  %p3705_p0 = pnand %p3712_p13, %p3998_p3 }
  0x1b   : > { %s189_s7 = sshll.u32 %s188_s6, 4  ;;  %s179_s25 = scalar_lea.sflag [#allocation3], %s178_s9  ;;  %s190_s7 = int_to_ptr.hbm [resolvable:$true] %s189_s7 }
  0x1c   : > { %s3909_s27 = smov 256   ;;  %s3910_s10 = smov 128  }
  0x1d   : > { %s3911_s17 = smov 8   ;;  %p3668_p1 = scmp.ge.s32.totalorder %s3903_s22, 1 }
  0x1e   : > { %3707 = dma.hbm_to_vmem [thread:$0]  (!%p3705_p0), %s190_s7, 512, %s192_s23, %s179_s25, %s3909_s27, %s3910_s10, %s3911_s17  }
  0x1f   : > { %p199_p2 = scmp.lt.s32.totalorder %s3903_s22, 5 }
  0x21   : > { %p200_p4 = pnand %p3668_p1, %p199_p2 }
  0x23   : > { %203 = sbr.rel (%p200_p4) target bundleno = 1137 (0x471), region = 36 }
  0x28   : > { %s4035_s11 = sand.u32 1, %s3879_s16  }
  0x29   : > { %s3669_s26 = sshll.u32 %s4035_s11, 5  ;;  %s206_s29 = scalar_lea.sflag [#allocation3], %s4035_s11 }
  0x2a   : > { %s4039_s12 = scalar_lea.vmem [#allocation2], %s3669_s26 }
  0x2b   : > { %3866 = dma.done.wait (%p4006_p8), %s206_s29, 512  }
  0x2c   : > { %3868 = vsyncadd (%p4006_p8), %s206_s29, 4294966784  ;;  %v3912_v0 = vmov 0   ;;  %s3670_s17 = sshll.u32 %s4035_s11, 6  ;;  %v4049_v1 = vld [vmem:[%s4583_s2] sm:$0xff]  ;;  %v4054_v2 = vld [vmem:[%s4583_s2 + $0x8] sm:$0xff]  ;;  %v238_v11 = vlaneseq  ;;  %s4102_s24 = smov 0  }
  0x2d   : > { %3798 = vset.pattern.permute.xlu1 %v3912_v0  ;;  %3797 = vset.pattern.permute.xlu0 %v3912_v0  ;;  %4601 = vst [vmem:[#allocation14_spill] sm:$0xff] %v4049_v1  ;;  %v4059_v3 = vld [vmem:[%s4581_s0] sm:$0xf]  ;;  %v4064_v4 = vld [vmem:[%s4581_s0 + $0x4] sm:$0xf]  ;;  %s4100_s30 = scalar_lea.vmem [#allocation5], %s3670_s17 }
  0x2e   : > { %4602 = vst [vmem:[#allocation15_spill] sm:$0xff] %v4054_v2  ;;  %v4069_v5 = vld [vmem:[%s4581_s0 + $0x8] sm:$0xf]  ;;  %v4074_v6 = vld [vmem:[%s4581_s0 + $0xc] sm:$0xf]  ;;  %v239_v12 = vand.u32 127, %v238_v11 }
  0x2f   : > { %4603 = vst [vmem:[#allocation16_spill] sm:$0xff] %v4059_v3  ;;  %v273_v7 = vld [vmem:[%s4582_s1 + $0xc] sm:$0xf]  ;;  %v257_v8 = vld [vmem:[%s4582_s1 + $0x4] sm:$0xf] }
  0x30   : > { %4604 = vst [vmem:[#allocation17_spill] sm:$0xff] %v4064_v4  ;;  %276 = vperm.xlu1 %3798, %v273_v7   ;;  %263 = vperm.xlu0 %3797, %v257_v8   ;;  %v272_v9 = vld [vmem:[%s4582_s1 + $0x8] sm:$0xf]  ;;  %v256_v10 = vld [vmem:[%s4582_s1] sm:$0xf]  ;;  %v244_v15 = vand.u32 1, %v239_v12 }
  0x31   : > { %4605 = vst [vmem:[#allocation18_spill] sm:$0xff] %v4069_v5 }
  0x32   : > { %4606 = vst [vmem:[#allocation19_spill] sm:$0xff] %v4074_v6  ;;  %vm4088_vm0 = vcmp.eq.s32.totalorder %v244_v15, 1 }
  0x38   : > { %281 = vperm.xlu1 %3798, %v272_v9   ;;  %268 = vperm.xlu0 %3797, %v256_v10  }
  0xa2   : > { %v277_v13 = vpop.permute.xlu1 %276  ;;  %v264_v14 = vpop.permute.xlu0 %263 }
  0xaa   : > { %v282_v17 = vpop.permute.xlu1 %281  ;;  %v269_v18 = vpop.permute.xlu0 %268 }
  0xab   : > { %v4094_v19 = vsel %vm4088_vm0, %v277_v13, %v282_v17  ;;  %v4098_v20 = vsel %vm4088_vm0, %v264_v14, %v269_v18 }
  0xac   : > { %4609 = vst [vmem:[#allocation20_spill] sm:$0xff] %v4094_v19 }
  0xad   : > { %4610 = vst [vmem:[#allocation21_spill] sm:$0xff] %v4098_v20 }
  0xae LB: >> { %v4611_v2 = vld [vmem:[#allocation15_spill] sm:$0xff]  ;;  %v4612_v1 = vld [vmem:[#allocation14_spill] sm:$0xff]  ;;  %s3671_s17 = sshll.u32 %s3907_s24, 2  ;;  %vm302_vm1 = vcmask 1041409   ;;  %vm305_vm2 = vcmask 1042434   ;;  %vm308_vm3 = vcmask 1043459   ;;  %s3907_s24 = sphi %s4102_s24, %s290_s24  }
  0xaf   : >> { %v4108_v21 = vand.u32 4294901760, %v4611_v2  ;;  %v4111_v22 = vand.u32 4294901760, %v4612_v1  ;;  %s4121_s28 = scalar_lea.vmem %s4039_s12, %s3671_s17 [#allocation2]  ;;  %vm310_vm4 = vcmask 130048   ;;  %vm472_vm5 = vcmask 31744   ;;  %v4613_v3 = vld [vmem:[#allocation16_spill] sm:$0xff]  ;;  %v4614_v4 = vld [vmem:[#allocation17_spill] sm:$0xff] }
  0xb0   : >> { %v293_v25 = vld [vmem:[%s4121_s28] sm:$0x1]  ;;  %v294_v26 = vld [vmem:[%s4121_s28 + $0x8] sm:$0x1]  ;;  %v295_v27 = vld [vmem:[%s4121_s28 + $0x10] sm:$0x1] }
  0xb1   : >> { %v4115_v23 = vsub.f32 %v4611_v2, %v4108_v21  ;;  %412 = vmatpush.msra.mxu3 %v4108_v21  ;;  %328 = vmatpush.msra.mxu0 %v4108_v21  ;;  %v4126_v24 = vsub.f32 %v4612_v1, %v4111_v22  ;;  %v296_v28 = vld [vmem:[%s4121_s28 + $0x18] sm:$0x1]  ;;  %v301_v29 = vrot.slane %v294_v26, 7  ;;  %v304_v30 = vrot.slane %v295_v27, 6  ;;  %v4615_v5 = vld [vmem:[#allocation18_spill] sm:$0xff]  ;;  %v4616_v6 = vld [vmem:[#allocation19_spill] sm:$0xff] }
  0xb2   : >> { %v307_v31 = vrot.slane %v296_v28, 5  ;;  %v474_v47 = vsel %vm472_vm5, %v4613_v3, 0  ;;  %v627_v57 = vsel %vm472_vm5, %v4614_v4, 0  ;;  %vm476_vm6 = vcmask 1043456   ;;  %v3674_v28 = vld [vmem:[%s4121_s28 + $0x9] sm:$0x1] }
  0xb3   : >> { %387 = vmatpush.msra.mxu2 %v4115_v23  ;;  %414 = vmatpush.msra.mxu3 %v4111_v22  ;;  %v4136_v32 = vand.u32 4294901760, %v4115_v23  ;;  %v303_v33 = vsel %vm302_vm1, %v301_v29, %v293_v25  ;;  %v4143_v36 = vand.u32 4294901760, %v4126_v24  ;;  %v4161_v48 = vand.u32 4294901760, %v474_v47  ;;  %v3675_v29 = vld [vmem:[%s4121_s28 + $0x11] sm:$0x1]  ;;  %s3687_s6 = sshll.u32 %s3907_s24, 3 }
  0xb4   : >> { %330 = vmatpush.msra.mxu0 %v4111_v22  ;;  %v306_v34 = vsel %vm305_vm2, %v304_v30, %v303_v33  ;;  %v4173_v63 = vand.u32 4294901760, %v627_v57  ;;  %v778_v14 = vsel %vm472_vm5, %v4615_v5, 0  ;;  %v1087_v30 = vrot.slane %v3674_v28, 7  ;;  %v3673_v33 = vld [vmem:[%s4121_s28 + $0x1] sm:$0x1]  ;;  %s3507_s7 = scalar_lea.vmem %s4100_s30, %s3687_s6 [#allocation5]  ;;  %s290_s24 = sadd.s32 1, %s3907_s24  }
  0xb5   : >> { %390 = vmatpush.msra.mxu2 %v4126_v24  ;;  %v357_v35 = vsub.f32 %v4115_v23, %v4136_v32  ;;  %v309_v37 = vsel %vm308_vm3, %v307_v31, %v306_v34  ;;  %v363_v41 = vsub.f32 %v4126_v24, %v4143_v36  ;;  %v4164_v53 = vsub.f32 %v474_v47, %v4161_v48  ;;  %p287_p3 = scmp.ge.s32.totalorder %s290_s24, 2  }
  0xb6   : >> { %439 = vmatpush.msrb.mxu0 %v4136_v32  ;;  %v311_v38 = vsel %vm310_vm4, %v309_v37, 0  ;;  %v4179_v9 = vsub.f32 %v627_v57, %v4173_v63  ;;  %v4197_v18 = vand.u32 4294901760, %v778_v14  ;;  %v927_v34 = vsel %vm472_vm5, %v4616_v6, 0  ;;  %s3514_s27 = scalar_lea.sflag (%p287_p3), [#allocation4], %s4035_s11 }
  0xb7   : >> { %v4148_v39 = vand.u32 4294901760, %v357_v35  ;;  %v331_v40 = vand.u32 4294901760, %v311_v38  ;;  %v4154_v43 = vand.u32 4294901760, %v363_v41  ;;  %v4167_v56 = vand.u32 4294901760, %v4164_v53  ;;  %v3676_v35 = vld [vmem:[%s4121_s28 + $0x19] sm:$0x1] }
  0xb8   : >> { %443 = vmatpush.msrb.mxu0 %v4143_v36  ;;  %v4189_v12 = vand.u32 4294901760, %v4179_v9  ;;  %v4204_v27 = vsub.f32 %v778_v14, %v4197_v18  ;;  %v1089_v37 = vrot.slane %v3675_v29, 6  ;;  %v4227_v41 = vand.u32 4294901760, %v927_v34 }
  0xb9   : >> { %359 = vmatpush.msra.mxu1 %v4148_v39  ;;  %v332_v42 = vsub.f32 %v311_v38, %v331_v40  ;;  %v500_v62 = vsub.f32 %v4164_v53, %v4167_v56  ;;  %v1088_v38 = vsel %vm302_vm1, %v1087_v30, %v3673_v33  ;;  %vm3472_vm7 = vcmask 1040384  }
  0xba   : >> { %v649_v17 = vsub.f32 %v4179_v9, %v4189_v12  ;;  %v4216_v31 = vand.u32 4294901760, %v4204_v27  ;;  %vm3477_vm8 = vcmask 1041408   ;;  %vm3482_vm9 = vcmask 1042432  }
  0xbb   : >> { %393 = vmatmul.f32.vlgmr.msra.gmra.mxu2 %v332_v42  ;;  %v333_v44 = vand.u32 4294901760, %v332_v42  ;;  %365 = vmatpush.msra.mxu1 %v4154_v43  ;;  %v4176_v8 = vand.u32 4294901760, %v500_v62  ;;  %vm3491_vm10 = vcmask 1044480   ;;  %vm3496_vm11 = vcmask 1045504  }
  0xbc   : >> { %367 = vmatmul.f32.vlgmr.msra.gmra.mxu1 %v331_v40  ;;  %v4201_v26 = vand.u32 4294901760, %v649_v17  ;;  %vm3501_vm12 = vcmask 1046528   ;;  %vm3508_vm13 = vcmask 261120  }
  0xbd   : >> { %418 = vmatmul.f32.vlgmr.msra.gmra.mxu3 %v333_v44  ;;  %v334_v45 = vsub.f32 %v332_v42, %v333_v44  ;;  %464 = vmatpush.msrb.mxu1 %v4108_v21  ;;  %v1091_v42 = vrot.slane %v3676_v35, 5  ;;  %v1090_v44 = vsel %vm305_vm2, %v1089_v37, %v1088_v38 }
  0xbf   : >> { %v335_v46 = vand.u32 4294901760, %v334_v45  ;;  %466 = vmatpush.msrb.mxu1 %v4111_v22  ;;  %v1092_v47 = vsel %vm308_vm3, %v1091_v42, %v1090_v44 }
  0xc1   : >> { %336 = vmatmul.f32.vlgmr.msra.gmra.mxu0 %v335_v46  ;;  %v4235_v46 = vsub.f32 %v927_v34, %v4227_v41 }
  0xc4   : >> { %468 = vmatmul.f32.vlgmr.msrb.gmra.mxu1 %v331_v40 }
  0xc9   : >> { %445 = vmatmul.f32.vlgmr.msrb.gmra.mxu0 %v331_v40  ;;  %v800_v40 = vsub.f32 %v4204_v27, %v4216_v31 }
  0xcb   : >> { %v4232_v45 = vand.u32 4294901760, %v800_v40 }
 0x139   : >> { %v368_v49 = vpop.f32.mrf.mxu1 }
 0x13e   : >> { %v337_v50 = vpop.f32.mrf.mxu0  ;;  %v394_v51 = vpop.f32.mrf.mxu2 }
 0x13f   : >> { %v369_v52 = vadd.f32 %v368_v49, %v337_v50  ;;  %v4242_v49 = vand.u32 4294901760, %v4235_v46  ;;  %v1093_v50 = vsel %vm310_vm4, %v1092_v47, 0 }
 0x140   : >> { %v419_v55 = vpop.f32.mrf.mxu3 }
 0x141   : >> { %v395_v54 = vadd.f32 %v394_v51, %v369_v52  ;;  %v469_v60 = vpop.f32.mrf.mxu1  ;;  %v1113_v51 = vand.u32 4294901760, %v1093_v50  ;;  %v949_v52 = vsub.f32 %v4235_v46, %v4242_v49 }
 0x143   : >> { %v420_v58 = vadd.f32 %v419_v55, %v395_v54  ;;  %v4253_v54 = vand.u32 4294901760, %v949_v52  ;;  %v1114_v55 = vsub.f32 %v1093_v50, %v1113_v51 }
 0x145   : >> { %v1115_v57 = vand.u32 4294901760, %v1114_v55 }
 0x146   : >> { %v446_v59 = vpop.f32.mrf.mxu0 }
 0x147   : >> { %v447_v61 = vadd.f32 %v446_v59, %v420_v58  ;;  %v1116_v58 = vsub.f32 %v1114_v55, %v1115_v57 }
 0x149   : >> { %v470_v0 = vadd.f32 %v469_v60, %v447_v61  ;;  %v1117_v59 = vand.u32 4294901760, %v1116_v58 }
 0x14b   : >> { %v478_v7 = vsel %vm476_vm6, %v470_v0, 0 }
 0x14c   : >> { %v4181_v10 = vand.u32 4294901760, %v478_v7 }
 0x14e   : >> { %v522_v11 = vsub.f32 %v478_v7, %v4181_v10  ;;  %496 = vmatpush.msrb.mxu2 %v4181_v10  ;;  %572 = vmatpush.msra.mxu1 %v4181_v10 }
 0x14f   : >> { %502 = vmatmul.f32.vlgmr.msrb.gmra.mxu2 %v4176_v8  ;;  %576 = vmatmul.f32.vlgmr.msra.gmra.mxu1 %v4167_v56 }
 0x150   : >> { %549 = vmatpush.msra.mxu0 %v522_v11  ;;  %v523_v13 = vand.u32 4294901760, %v522_v11 }
 0x151   : >> { %552 = vmatmul.f32.vlgmr.msra.gmra.mxu0 %v4164_v53 }
 0x152   : >> { %645 = vmatpush.msrb.mxu0 %v4181_v10  ;;  %598 = vmatpush.msra.mxu2 %v523_v13  ;;  %v524_v15 = vsub.f32 %v522_v11, %v523_v13 }
 0x154   : >> { %747 = vmatpush.msra.mxu0 %v523_v13  ;;  %698 = vmatpush.msrb.mxu2 %v522_v11  ;;  %v525_v25 = vand.u32 4294901760, %v524_v15 }
 0x156   : >> { %526 = vmatpush.msrb.mxu3 %v525_v25  ;;  %675 = vmatpush.msrb.mxu1 %v525_v25 }
 0x157   : >> { %528 = vmatmul.f32.vlgmr.msrb.gmra.mxu3 %v4161_v48  ;;  %600 = vmatmul.f32.vlgmr.msra.gmra.mxu2 %v4161_v48 }
 0x158   : >> { %620 = vmatpush.msra.mxu3 %v4181_v10  ;;  %677 = vmatmul.f32.vlgmr.msrb.gmra.mxu1 %v4173_v63 }
 0x159   : >> { %769 = vmatpush.msra.mxu1 %v4181_v10  ;;  %796 = vmatpush.msra.mxu2 %v4181_v10 }
 0x15a   : >> { %721 = vmatpush.msrb.mxu3 %v4181_v10  ;;  %651 = vmatmul.f32.vlgmr.msrb.gmra.mxu0 %v4201_v26 }
 0x15b   : >> { %872 = vmatpush.msrb.mxu1 %v4181_v10  ;;  %849 = vmatpush.msrb.mxu0 %v522_v11 }
 0x15f   : >> { %622 = vmatmul.f32.vlgmr.msra.gmra.mxu3 %v4161_v48  ;;  %701 = vmatmul.f32.vlgmr.msrb.gmra.mxu2 %v4179_v9 }
 0x160   : >> { %771 = vmatmul.f32.vlgmr.msra.gmra.mxu1 %v4173_v63  ;;  %826 = vmatpush.msra.mxu3 %v525_v25 }
 0x161   : >> { %898 = vmatpush.msrb.mxu2 %v523_v13  ;;  %975 = vmatpush.msra.mxu1 %v525_v25 }
 0x162   : >> { %749 = vmatmul.f32.vlgmr.msra.gmra.mxu0 %v4173_v63 }
 0x163   : >> { %945 = vmatpush.msra.mxu0 %v4181_v10 }
 0x167   : >> { %725 = vmatmul.f32.vlgmr.msrb.gmra.mxu3 %v4189_v12  ;;  %802 = vmatmul.f32.vlgmr.msra.gmra.mxu2 %v4232_v45 }
 0x168   : >> { %876 = vmatmul.f32.vlgmr.msrb.gmra.mxu1 %v4216_v31  ;;  %920 = vmatpush.msrb.mxu3 %v4181_v10 }
 0x169   : >> { %998 = vmatpush.msra.mxu2 %v522_v11  ;;  %1069 = vmatpush.msrb.mxu1 %v4181_v10 }
 0x16a   : >> { %852 = vmatmul.f32.vlgmr.msrb.gmra.mxu0 %v4204_v27 }
 0x16b   : >> { %1047 = vmatpush.msrb.mxu0 %v523_v13 }
 0x16f   : >> { %828 = vmatmul.f32.vlgmr.msra.gmra.mxu3 %v4197_v18  ;;  %900 = vmatmul.f32.vlgmr.msrb.gmra.mxu2 %v4197_v18 }
 0x170   : >> { %1021 = vmatpush.msra.mxu3 %v4181_v10  ;;  %977 = vmatmul.f32.vlgmr.msra.gmra.mxu1 %v4227_v41 }
 0x171   : >> { %1110 = vmatpush.msrb.mxu2 %v4108_v21  ;;  %1194 = vmatpush.msra.mxu1 %v4108_v21 }
 0x172   : >> { %951 = vmatmul.f32.vlgmr.msra.gmra.mxu0 %v4253_v54 }
 0x173   : >> { %1112 = vmatpush.msrb.mxu2 %v4111_v22  ;;  %1169 = vmatpush.msra.mxu0 %v4115_v23 }
 0x174   : >> { %1196 = vmatpush.msra.mxu1 %v4111_v22 }
 0x175   : >> { %1172 = vmatpush.msra.mxu0 %v4126_v24 }
 0x177   : >> { %922 = vmatmul.f32.vlgmr.msrb.gmra.mxu3 %v4197_v18  ;;  %1001 = vmatmul.f32.vlgmr.msra.gmra.mxu2 %v4235_v46 }
 0x178   : >> { %1141 = vmatpush.msrb.mxu3 %v4148_v39  ;;  %1071 = vmatmul.f32.vlgmr.msrb.gmra.mxu1 %v4227_v41 }
 0x179   : >> { %1221 = vmatpush.msra.mxu2 %v4136_v32 }
 0x17a   : >> { %1147 = vmatpush.msrb.mxu3 %v4154_v43  ;;  %1049 = vmatmul.f32.vlgmr.msrb.gmra.mxu0 %v4227_v41 }
 0x17b   : >> { %1225 = vmatpush.msra.mxu2 %v4143_v36 }
 0x17f   : >> { %1025 = vmatmul.f32.vlgmr.msra.gmra.mxu3 %v4242_v49  ;;  %1118 = vmatmul.f32.vlgmr.msrb.gmra.mxu2 %v1117_v59 }
 0x180   : >> { %1246 = vmatpush.msra.mxu3 %v4108_v21  ;;  %1200 = vmatmul.f32.vlgmr.msra.gmra.mxu1 %v1115_v57 }
 0x182   : >> { %1248 = vmatpush.msra.mxu3 %v4111_v22  ;;  %1175 = vmatmul.f32.vlgmr.msra.gmra.mxu0 %v1114_v55 }
 0x187   : >> { %1149 = vmatmul.f32.vlgmr.msrb.gmra.mxu3 %v1113_v51  ;;  %1227 = vmatmul.f32.vlgmr.msra.gmra.mxu2 %v1113_v51 }
 0x18f   : >> { %1250 = vmatmul.f32.vlgmr.msra.gmra.mxu3 %v1113_v51 }
 0x1cc   : >> { %v4275_v60 = vpop.f32.mrf.mxu1 }
 0x1ce   : >> { %v4277_v61 = vpop.f32.mrf.mxu0 }
 0x1d2   : >> { %v4279_v62 = vpop.f32.mrf.mxu2 }
 0x1d5   : >> { %v4281_v0 = vpop.f32.mrf.mxu1 }
 0x1d7   : >> { %v4283_v7 = vpop.f32.mrf.mxu0 }
 0x1da   : >> { %v4285_v10 = vpop.f32.mrf.mxu3  ;;  %v4287_v11 = vpop.f32.mrf.mxu2 }
 0x1dd   : >> { %v4289_v13 = vpop.f32.mrf.mxu1 }
 0x1df   : >> { %v4291_v14 = vpop.f32.mrf.mxu0 }
 0x1e2   : >> { %v4293_v15 = vpop.f32.mrf.mxu3  ;;  %v4295_v17 = vpop.f32.mrf.mxu2 }
 0x1e5   : >> { %v4297_v25 = vpop.f32.mrf.mxu1 }
 0x1e7   : >> { %v4299_v28 = vpop.f32.mrf.mxu0 }
 0x1ea   : >> { %v4301_v29 = vpop.f32.mrf.mxu3  ;;  %v4303_v30 = vpop.f32.mrf.mxu2 }
 0x1ed   : >> { %v978_v33 = vpop.f32.mrf.mxu1 }
 0x1ef   : >> { %v952_v34 = vpop.f32.mrf.mxu0 }
 0x1f0   : >> { %v979_v35 = vadd.f32 %v978_v33, %v952_v34 }
 0x1f2   : >> { %v4305_v37 = vpop.f32.mrf.mxu3  ;;  %v4307_v38 = vpop.f32.mrf.mxu2 }
 0x1f5   : >> { %v1072_v51 = vpop.f32.mrf.mxu1 }
 0x1f7   : >> { %v1050_v47 = vpop.f32.mrf.mxu0 }
 0x1fa   : >> { %v4309_v40 = vpop.f32.mrf.mxu3  ;;  %v1002_v42 = vpop.f32.mrf.mxu2 }
 0x1fb   : >> { %v1003_v44 = vadd.f32 %v1002_v42, %v979_v35 }
 0x1fd   : >> { %v1201_v33 = vpop.f32.mrf.mxu1 }
 0x1ff   : >> { %v1176_v1 = vpop.f32.mrf.mxu0 }
 0x202   : >> { %v1026_v50 = vpop.f32.mrf.mxu3  ;;  %v1119_v55 = vpop.f32.mrf.mxu2 }
 0x203   : >> { %v1027_v52 = vadd.f32 %v1026_v50, %v1003_v44 }
 0x205   : >> { %v1051_v57 = vadd.f32 %v1050_v47, %v1027_v52 }
 0x207   : >> { %v4311_v58 = vadd.f32 %v1072_v51, %v1051_v57 }
 0x20a   : >> { %v1150_v59 = vpop.f32.mrf.mxu3  ;;  %v1228_v3 = vpop.f32.mrf.mxu2 }
 0x20b   : >> { %v1151_v2 = vadd.f32 %v1150_v59, %v1119_v55 }
 0x20d   : >> { %v1177_v34 = vadd.f32 %v1176_v1, %v1151_v2 }
 0x20f   : >> { %v1202_v4 = vadd.f32 %v1201_v33, %v1177_v34 }
 0x211   : >> { %v1229_v5 = vadd.f32 %v1228_v3, %v1202_v4  ;;  %v3679_v3 = vld [vmem:[%s4121_s28 + $0xa] sm:$0x1]  ;;  %v3680_v4 = vld [vmem:[%s4121_s28 + $0x12] sm:$0x1] }
 0x212   : >> { %v1251_v6 = vpop.f32.mrf.mxu3  ;;  %v1857_v47 = vrot.slane %v3680_v4, 6 }
 0x213   : >> { %v1252_v20 = vadd.f32 %v1251_v6, %v1229_v5  ;;  %v1855_v5 = vrot.slane %v3679_v3, 7  ;;  %v3678_v6 = vld [vmem:[%s4121_s28 + $0x2] sm:$0x1]  ;;  %v679_v3 = vadd.f32 %v4281_v0, %v4283_v7 }
 0x215   : >> { %v1255_v35 = vsel %vm476_vm6, %v1252_v20, 0  ;;  %v3681_v20 = vld [vmem:[%s4121_s28 + $0x1a] sm:$0x1]  ;;  %v1856_v50 = vsel %vm302_vm1, %v1855_v5, %v3678_v6 }
 0x216   : >> { %v1272_v42 = vand.u32 4294901760, %v1255_v35  ;;  %v1859_v51 = vrot.slane %v3681_v20, 5  ;;  %v1858_v52 = vsel %vm305_vm2, %v1857_v47, %v1856_v50 }
 0x218   : >> { %v1299_v19 = vsub.f32 %v1255_v35, %v1272_v42  ;;  %1273 = vmatpush.msrb.mxu0 %v1272_v42  ;;  %1349 = vmatpush.msrb.mxu3 %v1272_v42  ;;  %v1860_v55 = vsel %vm308_vm3, %v1859_v51, %v1858_v52  ;;  %v703_v51 = vadd.f32 %v4295_v17, %v679_v3 }
 0x219   : >> { %1279 = vmatmul.f32.vlgmr.msrb.gmra.mxu0 %v4176_v8  ;;  %1353 = vmatmul.f32.vlgmr.msrb.gmra.mxu3 %v4167_v56  ;;  %v1861_v57 = vsel %vm310_vm4, %v1860_v55, 0 }
 0x21a   : >> { %1326 = vmatpush.msrb.mxu2 %v1299_v19  ;;  %v1300_v44 = vand.u32 4294901760, %v1299_v19  ;;  %v1881_v59 = vand.u32 4294901760, %v1861_v57 }
 0x21b   : >> { %1329 = vmatmul.f32.vlgmr.msrb.gmra.mxu2 %v4164_v53 }
 0x21c   : >> { %1419 = vmatpush.msra.mxu2 %v1272_v42  ;;  %1375 = vmatpush.msra.mxu0 %v1300_v44  ;;  %v1301_v1 = vsub.f32 %v1299_v19, %v1300_v44  ;;  %v1882_v33 = vsub.f32 %v1861_v57, %v1881_v59 }
 0x21e   : >> { %1521 = vmatpush.msrb.mxu2 %v1300_v44  ;;  %1472 = vmatpush.msrb.mxu0 %v1299_v19  ;;  %v1302_v2 = vand.u32 4294901760, %v1301_v1 }
 0x220   : >> { %1303 = vmatpush.msrb.mxu1 %v1302_v2  ;;  %1449 = vmatpush.msra.mxu3 %v1302_v2 }
 0x221   : >> { %1305 = vmatmul.f32.vlgmr.msrb.gmra.mxu1 %v4161_v48  ;;  %1377 = vmatmul.f32.vlgmr.msra.gmra.mxu0 %v4161_v48 }
 0x222   : >> { %1397 = vmatpush.msra.mxu1 %v1272_v42  ;;  %1451 = vmatmul.f32.vlgmr.msra.gmra.mxu3 %v4173_v63 }
 0x223   : >> { %1543 = vmatpush.msrb.mxu3 %v1272_v42  ;;  %1567 = vmatpush.msra.mxu0 %v1272_v42 }
 0x224   : >> { %1495 = vmatpush.msrb.mxu1 %v1272_v42  ;;  %1425 = vmatmul.f32.vlgmr.msra.gmra.mxu2 %v4201_v26 }
 0x225   : >> { %1643 = vmatpush.msra.mxu3 %v1272_v42  ;;  %1620 = vmatpush.msra.mxu2 %v1299_v19 }
 0x229   : >> { %1399 = vmatmul.f32.vlgmr.msra.gmra.mxu1 %v4161_v48  ;;  %1475 = vmatmul.f32.vlgmr.msrb.gmra.mxu0 %v4179_v9 }
 0x22a   : >> { %1545 = vmatmul.f32.vlgmr.msrb.gmra.mxu3 %v4173_v63  ;;  %1597 = vmatpush.msra.mxu1 %v1302_v2 }
 0x22b   : >> { %1669 = vmatpush.msrb.mxu0 %v1300_v44  ;;  %1743 = vmatpush.msrb.mxu3 %v1302_v2  ;;  %v530_v2 = vadd.f32 %v4285_v10, %v4279_v62 }
 0x22c   : >> { %1523 = vmatmul.f32.vlgmr.msrb.gmra.mxu2 %v4173_v63 }
 0x22d   : >> { %1713 = vmatpush.msrb.mxu2 %v1272_v42  ;;  %v554_v50 = vadd.f32 %v4277_v61, %v530_v2 }
 0x22f   : >> { %v578_v62 = vadd.f32 %v4275_v60, %v554_v50 }
 0x231   : >> { %1499 = vmatmul.f32.vlgmr.msrb.gmra.mxu1 %v4189_v12  ;;  %1573 = vmatmul.f32.vlgmr.msra.gmra.mxu0 %v4232_v45  ;;  %v602_v17 = vadd.f32 %v4287_v11, %v578_v62 }
 0x232   : >> { %1647 = vmatmul.f32.vlgmr.msra.gmra.mxu3 %v4216_v31  ;;  %1691 = vmatpush.msrb.mxu1 %v1272_v42 }
 0x233   : >> { %1766 = vmatpush.msra.mxu0 %v1299_v19  ;;  %1837 = vmatpush.msra.mxu3 %v1272_v42  ;;  %v1883_v19 = vand.u32 4294901760, %v1882_v33 }
 0x234   : >> { %1623 = vmatmul.f32.vlgmr.msra.gmra.mxu2 %v4204_v27 }
 0x235   : >> { %1815 = vmatpush.msra.mxu2 %v1300_v44  ;;  %v1884_v34 = vsub.f32 %v1882_v33, %v1883_v19  ;;  %v830_v44 = vadd.f32 %v4305_v37, %v4303_v30  ;;  %v727_v37 = vadd.f32 %v4301_v29, %v703_v51 }
 0x237   : >> { %v1885_v35 = vand.u32 4294901760, %v1884_v34  ;;  %v854_v4 = vadd.f32 %v4299_v28, %v830_v44  ;;  %v751_v57 = vadd.f32 %v4291_v14, %v727_v37  ;;  %v624_v34 = vadd.f32 %v4293_v15, %v602_v17 }
 0x239   : >> { %1599 = vmatmul.f32.vlgmr.msra.gmra.mxu1 %v4197_v18  ;;  %1671 = vmatmul.f32.vlgmr.msrb.gmra.mxu0 %v4197_v18  ;;  %v878_v52 = vadd.f32 %v4297_v25, %v854_v4  ;;  %v773_v29 = vadd.f32 %v4289_v13, %v751_v57  ;;  %v4618_v4 = vld [vmem:[#allocation21_spill] sm:$0xff] }
 0x23a   : >> { %1789 = vmatpush.msra.mxu1 %v1272_v42  ;;  %1745 = vmatmul.f32.vlgmr.msrb.gmra.mxu3 %v4227_v41 }
 0x23b   : >> { %1878 = vmatpush.msrb.mxu0 %v4108_v21  ;;  %1962 = vmatpush.msrb.mxu3 %v4108_v21  ;;  %v902_v0 = vadd.f32 %v4307_v38, %v878_v52 }
 0x23c   : >> { %1719 = vmatmul.f32.vlgmr.msrb.gmra.mxu2 %v4253_v54 }
 0x23d   : >> { %1880 = vmatpush.msrb.mxu0 %v4111_v22  ;;  %1937 = vmatpush.msrb.mxu2 %v4115_v23  ;;  %v924_v25 = vadd.f32 %v4309_v40, %v902_v0 }
 0x23e   : >> { %1964 = vmatpush.msrb.mxu3 %v4111_v22 }
 0x23f   : >> { %1940 = vmatpush.msrb.mxu2 %v4126_v24  ;;  %v1075_v60 = vsel %vm4088_vm0, %v4311_v58, %v924_v25 }
 0x241   : >> { %1693 = vmatmul.f32.vlgmr.msrb.gmra.mxu1 %v4197_v18  ;;  %1769 = vmatmul.f32.vlgmr.msra.gmra.mxu0 %v4235_v46 }
 0x242   : >> { %1839 = vmatmul.f32.vlgmr.msra.gmra.mxu3 %v4227_v41  ;;  %1909 = vmatpush.msrb.mxu1 %v4148_v39 }
 0x243   : >> { %1989 = vmatpush.msra.mxu0 %v4136_v32 }
 0x244   : >> { %1915 = vmatpush.msrb.mxu1 %v4154_v43  ;;  %1817 = vmatmul.f32.vlgmr.msra.gmra.mxu2 %v4227_v41 }
 0x245   : >> { %1993 = vmatpush.msra.mxu0 %v4143_v36 }
 0x249   : >> { %1793 = vmatmul.f32.vlgmr.msra.gmra.mxu1 %v4242_v49  ;;  %1886 = vmatmul.f32.vlgmr.msrb.gmra.mxu0 %v1885_v35 }
 0x24a   : >> { %1968 = vmatmul.f32.vlgmr.msrb.gmra.mxu3 %v1883_v19  ;;  %2014 = vmatpush.msra.mxu1 %v4108_v21 }
 0x24c   : >> { %2016 = vmatpush.msra.mxu1 %v4111_v22  ;;  %1943 = vmatmul.f32.vlgmr.msrb.gmra.mxu2 %v1882_v33 }
 0x251   : >> { %1917 = vmatmul.f32.vlgmr.msrb.gmra.mxu1 %v1881_v59  ;;  %1995 = vmatmul.f32.vlgmr.msra.gmra.mxu0 %v1881_v59 }
 0x259   : >> { %2018 = vmatmul.f32.vlgmr.msra.gmra.mxu1 %v1881_v59 }
 0x296   : >> { %v1280_v42 = vpop.f32.mrf.mxu0 }
 0x29c   : >> { %v1354_v1 = vpop.f32.mrf.mxu3 }
 0x29e   : >> { %v1306_v5 = vpop.f32.mrf.mxu1  ;;  %v1330_v6 = vpop.f32.mrf.mxu2 }
 0x29f   : >> { %v1307_v20 = vadd.f32 %v1306_v5, %v1280_v42  ;;  %v1378_v47 = vpop.f32.mrf.mxu0  ;;  %v4617_v42 = vld [vmem:[#allocation20_spill] sm:$0xff] }
 0x2a0   : >> { %v1076_v14 = vadd.f32 %v1075_v60, %v4617_v42 }
 0x2a1   : >> { %v1331_v30 = vadd.f32 %v1330_v6, %v1307_v20 }
 0x2a2   : >> { %v3389_v5 = vrot.slane %v1076_v14, 1  ;;  %v3390_v6 = vrot.slane %v1076_v14, 2  ;;  %v3391_v20 = vrot.slane %v1076_v14, 3 }
 0x2a3   : >> { %v1355_v55 = vadd.f32 %v1354_v1, %v1331_v30  ;;  %v775_v1 = vsel %vm4088_vm0, %v773_v29, %v624_v34 }
 0x2a4   : >> { %v776_v13 = vadd.f32 %v775_v1, %v4618_v4  ;;  %v3417_v52 = vperm.slane %v3389_v5, 0  ;;  %v3419_v62 = vperm.slane %v3391_v20, 0 }
 0x2a5   : >> { %v1379_v7 = vadd.f32 %v1378_v47, %v1355_v55  ;;  %v1452_v10 = vpop.f32.mrf.mxu3  ;;  %v3416_v47 = vperm.slane %v1076_v14, 0  ;;  %v3418_v55 = vperm.slane %v3390_v6, 0 }
 0x2a6   : >> { %v1400_v28 = vpop.f32.mrf.mxu1  ;;  %v3382_v51 = vrot.slane %v776_v13, 1  ;;  %v3383_v17 = vrot.slane %v776_v13, 2  ;;  %v3384_v25 = vrot.slane %v776_v13, 3 }
 0x2a7   : >> { %v1401_v59 = vadd.f32 %v1400_v28, %v1379_v7  ;;  %v1476_v33 = vpop.f32.mrf.mxu0  ;;  %v1426_v61 = vpop.f32.mrf.mxu2 }
 0x2a8   : >> { %v1453_v19 = vadd.f32 %v1452_v10, %v1426_v61  ;;  %v3475_v14 = vsel %vm3472_vm7, %v3383_v17, %v3418_v55 }
 0x2aa   : >> { %v1477_v38 = vadd.f32 %v1476_v33, %v1453_v19 }
 0x2ad   : >> { %v1546_v35 = vpop.f32.mrf.mxu3 }
 0x2ae   : >> { %v1500_v44 = vpop.f32.mrf.mxu1 }
 0x2af   : >> { %v1501_v11 = vadd.f32 %v1500_v44, %v1477_v38  ;;  %v1574_v2 = vpop.f32.mrf.mxu0  ;;  %v1524_v40 = vpop.f32.mrf.mxu2  ;;  %v3476_v44 = vsel %vm3472_vm7, %v3384_v25, %v3419_v62 }
 0x2b1   : >> { %v1525_v3 = vadd.f32 %v1524_v40, %v1501_v11 }
 0x2b3   : >> { %v1547_v58 = vadd.f32 %v1546_v35, %v1525_v3  ;;  %v3474_v35 = vsel %vm3472_vm7, %v3382_v51, %v3417_v52 }
 0x2b5   : >> { %v1549_v15 = vsel %vm4088_vm0, %v1547_v58, %v1401_v59  ;;  %v1648_v50 = vpop.f32.mrf.mxu3  ;;  %v3473_v59 = vsel %vm3472_vm7, %v776_v13, %v3416_v47 }
 0x2b6   : >> { %v1550_v30 = vadd.f32 %v1549_v15, %v4618_v4  ;;  %v1600_v37 = vpop.f32.mrf.mxu1 }
 0x2b7   : >> { %v1601_v0 = vadd.f32 %v1600_v37, %v1574_v2  ;;  %v1672_v7 = vpop.f32.mrf.mxu0  ;;  %v1624_v61 = vpop.f32.mrf.mxu2 }
 0x2b8   : >> { %v3393_v10 = vrot.slane %v1550_v30, 1  ;;  %v3394_v28 = vrot.slane %v1550_v30, 2  ;;  %v3395_v57 = vrot.slane %v1550_v30, 3  ;;  %v3424_v33 = vperm.slane %v1550_v30, 0 }
 0x2b9   : >> { %v1625_v19 = vadd.f32 %v1624_v61, %v1601_v0 }
 0x2ba   : >> { %v3425_v29 = vperm.slane %v3393_v10, 0  ;;  %v3426_v60 = vperm.slane %v3394_v28, 0  ;;  %v3427_v38 = vperm.slane %v3395_v57, 0  ;;  %v3478_v34 = vsel %vm3477_vm8, %v3473_v59, %v3424_v33 }
 0x2bb   : >> { %v1649_v1 = vadd.f32 %v1648_v50, %v1625_v19 }
 0x2bc   : >> { %v3479_v11 = vsel %vm3477_vm8, %v3474_v35, %v3425_v29  ;;  %v3480_v2 = vsel %vm3477_vm8, %v3475_v14, %v3426_v60  ;;  %v3481_v40 = vsel %vm3477_vm8, %v3476_v44, %v3427_v38 }
 0x2bd   : >> { %v1673_v3 = vadd.f32 %v1672_v7, %v1649_v1  ;;  %v1746_v5 = vpop.f32.mrf.mxu3 }
 0x2be   : >> { %v1694_v13 = vpop.f32.mrf.mxu1 }
 0x2bf   : >> { %v1695_v6 = vadd.f32 %v1694_v13, %v1673_v3  ;;  %v1720_v20 = vpop.f32.mrf.mxu2  ;;  %v1770_v58 = vpop.f32.mrf.mxu0 }
 0x2c0   : >> { %v1747_v47 = vadd.f32 %v1746_v5, %v1720_v20 }
 0x2c2   : >> { %v1771_v15 = vadd.f32 %v1770_v58, %v1747_v47 }
 0x2c5   : >> { %v1840_v52 = vpop.f32.mrf.mxu3 }
 0x2c6   : >> { %v1794_v51 = vpop.f32.mrf.mxu1 }
 0x2c7   : >> { %v1795_v30 = vadd.f32 %v1794_v51, %v1771_v15  ;;  %v1818_v37 = vpop.f32.mrf.mxu2  ;;  %v1887_v55 = vpop.f32.mrf.mxu0  ;;  %v3685_v51 = vld [vmem:[%s4121_s28 + $0x13] sm:$0x1] }
 0x2c9   : >> { %v1819_v50 = vadd.f32 %v1818_v37, %v1795_v30  ;;  %v3683_v30 = vld [vmem:[%s4121_s28 + $0x3] sm:$0x1]  ;;  %v3686_v37 = vld [vmem:[%s4121_s28 + $0x1b] sm:$0x1] }
 0x2cb   : >> { %v1841_v62 = vadd.f32 %v1840_v52, %v1819_v50 }
 0x2cd   : >> { %v1843_v0 = vsel %vm4088_vm0, %v1841_v62, %v1695_v6  ;;  %v1969_v59 = vpop.f32.mrf.mxu3  ;;  %v2627_v62 = vrot.slane %v3686_v37, 5 }
 0x2ce   : >> { %v1844_v10 = vadd.f32 %v1843_v0, %v4617_v42  ;;  %v1918_v7 = vpop.f32.mrf.mxu1 }
 0x2cf   : >> { %v1919_v28 = vadd.f32 %v1918_v7, %v1887_v55  ;;  %v1944_v25 = vpop.f32.mrf.mxu2  ;;  %v1996_v14 = vpop.f32.mrf.mxu0  ;;  %v2625_v55 = vrot.slane %v3685_v51, 6 }
 0x2d0   : >> { %v3397_v57 = vrot.slane %v1844_v10, 1  ;;  %v3398_v33 = vrot.slane %v1844_v10, 2  ;;  %v3399_v61 = vrot.slane %v1844_v10, 3  ;;  %v3432_v17 = vperm.slane %v1844_v10, 0 }
 0x2d1   : >> { %v1945_v19 = vadd.f32 %v1944_v25, %v1919_v28 }
 0x2d2   : >> { %v3433_v29 = vperm.slane %v3397_v57, 0  ;;  %v3434_v60 = vperm.slane %v3398_v33, 0  ;;  %v3435_v38 = vperm.slane %v3399_v61, 0  ;;  %v4398_v35 = vsel %vm3482_vm9, %v3478_v34, %v3432_v17 }
 0x2d3   : >> { %v1970_v44 = vadd.f32 %v1969_v59, %v1945_v19 }
 0x2d4   : >> { %v4401_v1 = vsel %vm3482_vm9, %v3479_v11, %v3433_v29  ;;  %v4404_v3 = vsel %vm3482_vm9, %v3480_v2, %v3434_v60  ;;  %v4407_v13 = vsel %vm3482_vm9, %v3481_v40, %v3435_v38  ;;  %v3684_v40 = vld [vmem:[%s4121_s28 + $0xb] sm:$0x1] }
 0x2d5   : >> { %v1997_v5 = vadd.f32 %v1996_v14, %v1970_v44  ;;  %v2623_v52 = vrot.slane %v3684_v40, 7 }
 0x2d6   : >> { %v2019_v6 = vpop.f32.mrf.mxu1 }
 0x2d7   : >> { %v2020_v20 = vadd.f32 %v2019_v6, %v1997_v5  ;;  %v2624_v50 = vsel %vm302_vm1, %v2623_v52, %v3683_v30 }
 0x2d8   : >> { %v2626_v0 = vsel %vm305_vm2, %v2625_v55, %v2624_v50 }
 0x2d9   : >> { %v2023_v58 = vsel %vm476_vm6, %v2020_v20, 0  ;;  %v2628_v10 = vsel %vm308_vm3, %v2627_v62, %v2626_v0 }
 0x2da   : >> { %v2040_v47 = vand.u32 4294901760, %v2023_v58  ;;  %v2629_v7 = vsel %vm310_vm4, %v2628_v10, 0 }
 0x2db   : >> { %v2649_v28 = vand.u32 4294901760, %v2629_v7 }
 0x2dc   : >> { %v2067_v15 = vsub.f32 %v2023_v58, %v2040_v47  ;;  %2041 = vmatpush.msra.mxu2 %v2040_v47  ;;  %2117 = vmatpush.msrb.mxu1 %v2040_v47 }
 0x2dd   : >> { %2047 = vmatmul.f32.vlgmr.msra.gmra.mxu2 %v4176_v8  ;;  %2121 = vmatmul.f32.vlgmr.msrb.gmra.mxu1 %v4167_v56  ;;  %v2650_v57 = vsub.f32 %v2629_v7, %v2649_v28 }
 0x2de   : >> { %2094 = vmatpush.msrb.mxu0 %v2067_v15  ;;  %v2068_v34 = vand.u32 4294901760, %v2067_v15 }
 0x2df   : >> { %2097 = vmatmul.f32.vlgmr.msrb.gmra.mxu0 %v4164_v53  ;;  %v2651_v33 = vand.u32 4294901760, %v2650_v57 }
 0x2e0   : >> { %2187 = vmatpush.msra.mxu0 %v2040_v47  ;;  %2143 = vmatpush.msrb.mxu2 %v2068_v34  ;;  %v2069_v11 = vsub.f32 %v2067_v15, %v2068_v34 }
 0x2e1   : >> { %v2652_v61 = vsub.f32 %v2650_v57, %v2651_v33 }
 0x2e2   : >> { %2289 = vmatpush.msrb.mxu0 %v2068_v34  ;;  %2240 = vmatpush.msra.mxu2 %v2067_v15  ;;  %v2070_v2 = vand.u32 4294901760, %v2069_v11 }
 0x2e3   : >> { %v2653_v17 = vand.u32 4294901760, %v2652_v61 }
 0x2e4   : >> { %2071 = vmatpush.msra.mxu3 %v2070_v2  ;;  %2217 = vmatpush.msra.mxu1 %v2070_v2 }
 0x2e5   : >> { %2073 = vmatmul.f32.vlgmr.msra.gmra.mxu3 %v4161_v48  ;;  %2145 = vmatmul.f32.vlgmr.msrb.gmra.mxu2 %v4161_v48 }
 0x2e6   : >> { %2165 = vmatpush.msrb.mxu3 %v2040_v47  ;;  %2219 = vmatmul.f32.vlgmr.msra.gmra.mxu1 %v4173_v63 }
 0x2e7   : >> { %2311 = vmatpush.msrb.mxu1 %v2040_v47  ;;  %2335 = vmatpush.msrb.mxu2 %v2040_v47 }
 0x2e8   : >> { %2263 = vmatpush.msra.mxu3 %v2040_v47  ;;  %2193 = vmatmul.f32.vlgmr.msra.gmra.mxu0 %v4201_v26 }
 0x2e9   : >> { %2411 = vmatpush.msra.mxu1 %v2040_v47  ;;  %2388 = vmatpush.msra.mxu0 %v2067_v15 }
 0x2ed   : >> { %2167 = vmatmul.f32.vlgmr.msrb.gmra.mxu3 %v4161_v48  ;;  %2243 = vmatmul.f32.vlgmr.msra.gmra.mxu2 %v4179_v9 }
 0x2ee   : >> { %2313 = vmatmul.f32.vlgmr.msrb.gmra.mxu1 %v4173_v63  ;;  %2365 = vmatpush.msrb.mxu3 %v2070_v2 }
 0x2ef   : >> { %2437 = vmatpush.msra.mxu2 %v2068_v34  ;;  %2511 = vmatpush.msrb.mxu1 %v2070_v2 }
 0x2f0   : >> { %2291 = vmatmul.f32.vlgmr.msrb.gmra.mxu0 %v4173_v63 }
 0x2f1   : >> { %2481 = vmatpush.msrb.mxu0 %v2040_v47 }
 0x2f5   : >> { %2267 = vmatmul.f32.vlgmr.msra.gmra.mxu3 %v4189_v12  ;;  %2341 = vmatmul.f32.vlgmr.msrb.gmra.mxu2 %v4232_v45 }
 0x2f6   : >> { %2415 = vmatmul.f32.vlgmr.msra.gmra.mxu1 %v4216_v31  ;;  %2459 = vmatpush.msra.mxu3 %v2040_v47 }
 0x2f7   : >> { %2534 = vmatpush.msrb.mxu2 %v2067_v15  ;;  %2605 = vmatpush.msra.mxu1 %v2040_v47 }
 0x2f8   : >> { %2391 = vmatmul.f32.vlgmr.msra.gmra.mxu0 %v4204_v27 }
 0x2f9   : >> { %2583 = vmatpush.msra.mxu0 %v2068_v34 }
 0x2fd   : >> { %2367 = vmatmul.f32.vlgmr.msrb.gmra.mxu3 %v4197_v18  ;;  %2439 = vmatmul.f32.vlgmr.msra.gmra.mxu2 %v4197_v18 }
 0x2fe   : >> { %2557 = vmatpush.msrb.mxu3 %v2040_v47  ;;  %2513 = vmatmul.f32.vlgmr.msrb.gmra.mxu1 %v4227_v41 }
 0x2ff   : >> { %2646 = vmatpush.msra.mxu2 %v4108_v21  ;;  %2730 = vmatpush.msrb.mxu1 %v4108_v21 }
 0x300   : >> { %2487 = vmatmul.f32.vlgmr.msrb.gmra.mxu0 %v4253_v54 }
 0x301   : >> { %2648 = vmatpush.msra.mxu2 %v4111_v22  ;;  %2705 = vmatpush.msrb.mxu0 %v4115_v23 }
 0x302   : >> { %2732 = vmatpush.msrb.mxu1 %v4111_v22 }
 0x303   : >> { %2708 = vmatpush.msrb.mxu0 %v4126_v24 }
 0x305   : >> { %2461 = vmatmul.f32.vlgmr.msra.gmra.mxu3 %v4197_v18  ;;  %2537 = vmatmul.f32.vlgmr.msrb.gmra.mxu2 %v4235_v46 }
 0x306   : >> { %2677 = vmatpush.msra.mxu3 %v4148_v39  ;;  %2607 = vmatmul.f32.vlgmr.msra.gmra.mxu1 %v4227_v41 }
 0x307   : >> { %2757 = vmatpush.msrb.mxu2 %v4136_v32 }
 0x308   : >> { %2683 = vmatpush.msra.mxu3 %v4154_v43  ;;  %2585 = vmatmul.f32.vlgmr.msra.gmra.mxu0 %v4227_v41 }
 0x309   : >> { %2761 = vmatpush.msrb.mxu2 %v4143_v36 }
 0x30d   : >> { %2561 = vmatmul.f32.vlgmr.msrb.gmra.mxu3 %v4242_v49  ;;  %2654 = vmatmul.f32.vlgmr.msra.gmra.mxu2 %v2653_v17 }
 0x30e   : >> { %2782 = vmatpush.msrb.mxu3 %v4108_v21  ;;  %2736 = vmatmul.f32.vlgmr.msrb.gmra.mxu1 %v2651_v33 }
 0x310   : >> { %2784 = vmatpush.msrb.mxu3 %v4111_v22  ;;  %2711 = vmatmul.f32.vlgmr.msrb.gmra.mxu0 %v2650_v57 }
 0x315   : >> { %2685 = vmatmul.f32.vlgmr.msra.gmra.mxu3 %v2649_v28  ;;  %2763 = vmatmul.f32.vlgmr.msrb.gmra.mxu2 %v2649_v28 }
 0x31d   : >> { %2786 = vmatmul.f32.vlgmr.msrb.gmra.mxu3 %v2649_v28 }
 0x35a   : >> { %v2122_v23 = vpop.f32.mrf.mxu1 }
 0x35c   : >> { %v2098_v24 = vpop.f32.mrf.mxu0 }
 0x360   : >> { %v2048_v32 = vpop.f32.mrf.mxu2 }
 0x363   : >> { %v2220_v39 = vpop.f32.mrf.mxu1 }
 0x365   : >> { %v2194_v43 = vpop.f32.mrf.mxu0 }
 0x366   : >> { %v2221_v25 = vadd.f32 %v2220_v39, %v2194_v43 }
 0x368   : >> { %v2074_v59 = vpop.f32.mrf.mxu3  ;;  %v2146_v36 = vpop.f32.mrf.mxu2 }
 0x369   : >> { %v2075_v19 = vadd.f32 %v2074_v59, %v2048_v32 }
 0x36b   : >> { %v2099_v29 = vadd.f32 %v2098_v24, %v2075_v19  ;;  %v2314_v60 = vpop.f32.mrf.mxu1 }
 0x36d   : >> { %v2123_v38 = vadd.f32 %v2122_v23, %v2099_v29  ;;  %v2292_v21 = vpop.f32.mrf.mxu0 }
 0x36f   : >> { %v2147_v14 = vadd.f32 %v2146_v36, %v2123_v38 }
 0x370   : >> { %v2168_v44 = vpop.f32.mrf.mxu3  ;;  %v2244_v22 = vpop.f32.mrf.mxu2 }
 0x371   : >> { %v2169_v5 = vadd.f32 %v2168_v44, %v2147_v14  ;;  %v2245_v6 = vadd.f32 %v2244_v22, %v2221_v25 }
 0x373   : >> { %v2416_v20 = vpop.f32.mrf.mxu1 }
 0x375   : >> { %v2392_v58 = vpop.f32.mrf.mxu0 }
 0x378   : >> { %v2268_v47 = vpop.f32.mrf.mxu3  ;;  %v2342_v15 = vpop.f32.mrf.mxu2 }
 0x379   : >> { %v2269_v34 = vadd.f32 %v2268_v47, %v2245_v6 }
 0x37b   : >> { %v2293_v11 = vadd.f32 %v2292_v21, %v2269_v34  ;;  %v2514_v2 = vpop.f32.mrf.mxu1 }
 0x37d   : >> { %v2315_v40 = vadd.f32 %v2314_v60, %v2293_v11  ;;  %v2488_v51 = vpop.f32.mrf.mxu0 }
 0x37e   : >> { %v2515_v30 = vadd.f32 %v2514_v2, %v2488_v51 }
 0x37f   : >> { %v2317_v52 = vsel %vm4088_vm0, %v2315_v40, %v2169_v5 }
 0x380   : >> { %v2318_v37 = vadd.f32 %v2317_v52, %v4618_v4  ;;  %v2368_v55 = vpop.f32.mrf.mxu3  ;;  %v2440_v50 = vpop.f32.mrf.mxu2 }
 0x381   : >> { %v2369_v62 = vadd.f32 %v2368_v55, %v2342_v15 }
 0x382   : >> { %v3401_v0 = vrot.slane %v2318_v37, 1  ;;  %v3402_v10 = vrot.slane %v2318_v37, 2  ;;  %v3403_v7 = vrot.slane %v2318_v37, 3  ;;  %v3440_v28 = vperm.slane %v2318_v37, 0 }
 0x383   : >> { %v2393_v57 = vadd.f32 %v2392_v58, %v2369_v62  ;;  %v2608_v21 = vpop.f32.mrf.mxu1 }
 0x384   : >> { %v3441_v33 = vperm.slane %v3401_v0, 0  ;;  %v3442_v61 = vperm.slane %v3402_v10, 0  ;;  %v3443_v17 = vperm.slane %v3403_v7, 0  ;;  %v3487_v23 = vsel %vm476_vm6, %v4398_v35, %v3440_v28 }
 0x385   : >> { %v2417_v24 = vadd.f32 %v2416_v20, %v2393_v57  ;;  %v2586_v60 = vpop.f32.mrf.mxu0 }
 0x386   : >> { %v3488_v32 = vsel %vm476_vm6, %v4401_v1, %v3441_v33  ;;  %v3489_v39 = vsel %vm476_vm6, %v4404_v3, %v3442_v61  ;;  %v3490_v43 = vsel %vm476_vm6, %v4407_v13, %v3443_v17 }
 0x387   : >> { %v2441_v25 = vadd.f32 %v2440_v50, %v2417_v24 }
 0x388   : >> { %v2462_v59 = vpop.f32.mrf.mxu3  ;;  %v2538_v36 = vpop.f32.mrf.mxu2 }
 0x389   : >> { %v2463_v19 = vadd.f32 %v2462_v59, %v2441_v25  ;;  %v2539_v29 = vadd.f32 %v2538_v36, %v2515_v30 }
 0x38b   : >> { %v2737_v34 = vpop.f32.mrf.mxu1 }
 0x38d   : >> { %v2712_v6 = vpop.f32.mrf.mxu0 }
 0x390   : >> { %v2562_v38 = vpop.f32.mrf.mxu3  ;;  %v2655_v35 = vpop.f32.mrf.mxu2 }
 0x391   : >> { %v2563_v14 = vadd.f32 %v2562_v38, %v2539_v29 }
 0x393   : >> { %v2587_v44 = vadd.f32 %v2586_v60, %v2563_v14 }
 0x395   : >> { %v2609_v22 = vadd.f32 %v2608_v21, %v2587_v44 }
 0x397   : >> { %v2611_v1 = vsel %vm4088_vm0, %v2609_v22, %v2463_v19 }
 0x398   : >> { %v2612_v3 = vadd.f32 %v2611_v1, %v4617_v42  ;;  %v2686_v5 = vpop.f32.mrf.mxu3  ;;  %v2764_v30 = vpop.f32.mrf.mxu2 }
 0x399   : >> { %v2687_v13 = vadd.f32 %v2686_v5, %v2655_v35 }
 0x39a   : >> { %v3405_v20 = vrot.slane %v2612_v3, 1  ;;  %v3406_v58 = vrot.slane %v2612_v3, 2  ;;  %v3407_v47 = vrot.slane %v2612_v3, 3  ;;  %v3448_v15 = vperm.slane %v2612_v3, 0 }
 0x39b   : >> { %v2713_v11 = vadd.f32 %v2712_v6, %v2687_v13 }
 0x39c   : >> { %v3449_v2 = vperm.slane %v3405_v20, 0  ;;  %v3450_v40 = vperm.slane %v3406_v58, 0  ;;  %v3451_v51 = vperm.slane %v3407_v47, 0  ;;  %v4469_v52 = vsel %vm3491_vm10, %v3487_v23, %v3448_v15 }
 0x39d   : >> { %v2738_v37 = vadd.f32 %v2737_v34, %v2713_v11 }
 0x39e   : >> { %v4472_v55 = vsel %vm3491_vm10, %v3488_v32, %v3449_v2  ;;  %v4475_v50 = vsel %vm3491_vm10, %v3489_v39, %v3450_v40  ;;  %v4478_v62 = vsel %vm3491_vm10, %v3490_v43, %v3451_v51 }
 0x39f   : >> { %v2765_v0 = vadd.f32 %v2764_v30, %v2738_v37 }
 0x3a0   : >> { %v2787_v10 = vpop.f32.mrf.mxu3 }
 0x3a1   : >> { %v2788_v7 = vadd.f32 %v2787_v10, %v2765_v0 }
 0x3a3   : >> { %v2791_v28 = vsel %vm476_vm6, %v2788_v7, 0 }
 0x3a4   : >> { %v2808_v57 = vand.u32 4294901760, %v2791_v28 }
 0x3a6   : >> { %v2835_v33 = vsub.f32 %v2791_v28, %v2808_v57  ;;  %2809 = vmatpush.msra.mxu0 %v2808_v57  ;;  %2885 = vmatpush.msra.mxu3 %v2808_v57 }
 0x3a7   : >> { %2815 = vmatmul.f32.vlgmr.msra.gmra.mxu0 %v4176_v8  ;;  %2889 = vmatmul.f32.vlgmr.msra.gmra.mxu3 %v4167_v56 }
 0x3a8   : >> { %2862 = vmatpush.msra.mxu2 %v2835_v33  ;;  %v2836_v61 = vand.u32 4294901760, %v2835_v33 }
 0x3a9   : >> { %2865 = vmatmul.f32.vlgmr.msra.gmra.mxu2 %v4164_v53 }
 0x3aa   : >> { %2955 = vmatpush.msrb.mxu2 %v2808_v57  ;;  %2911 = vmatpush.msrb.mxu0 %v2836_v61  ;;  %v2837_v17 = vsub.f32 %v2835_v33, %v2836_v61 }
 0x3ac   : >> { %3057 = vmatpush.msra.mxu2 %v2836_v61  ;;  %3008 = vmatpush.msra.mxu0 %v2835_v33  ;;  %v2838_v23 = vand.u32 4294901760, %v2837_v17 }
 0x3ae   : >> { %2839 = vmatpush.msra.mxu1 %v2838_v23  ;;  %2985 = vmatpush.msrb.mxu3 %v2838_v23 }
 0x3af   : >> { %2841 = vmatmul.f32.vlgmr.msra.gmra.mxu1 %v4161_v48  ;;  %2913 = vmatmul.f32.vlgmr.msrb.gmra.mxu0 %v4161_v48 }
 0x3b0   : >> { %2933 = vmatpush.msrb.mxu1 %v2808_v57  ;;  %2987 = vmatmul.f32.vlgmr.msrb.gmra.mxu3 %v4173_v63 }
 0x3b1   : >> { %3079 = vmatpush.msra.mxu3 %v2808_v57  ;;  %3103 = vmatpush.msrb.mxu0 %v2808_v57 }
 0x3b2   : >> { %3031 = vmatpush.msra.mxu1 %v2808_v57  ;;  %2961 = vmatmul.f32.vlgmr.msrb.gmra.mxu2 %v4201_v26 }
 0x3b3   : >> { %3179 = vmatpush.msrb.mxu3 %v2808_v57  ;;  %3156 = vmatpush.msrb.mxu2 %v2835_v33 }
 0x3b7   : >> { %2935 = vmatmul.f32.vlgmr.msrb.gmra.mxu1 %v4161_v48  ;;  %3011 = vmatmul.f32.vlgmr.msra.gmra.mxu0 %v4179_v9 }
 0x3b8   : >> { %3081 = vmatmul.f32.vlgmr.msra.gmra.mxu3 %v4173_v63  ;;  %3133 = vmatpush.msrb.mxu1 %v2838_v23 }
 0x3b9   : >> { %3205 = vmatpush.msra.mxu0 %v2836_v61  ;;  %3279 = vmatpush.msra.mxu3 %v2838_v23 }
 0x3ba   : >> { %3059 = vmatmul.f32.vlgmr.msra.gmra.mxu2 %v4173_v63 }
 0x3bb   : >> { %3249 = vmatpush.msra.mxu2 %v2808_v57 }
 0x3bf   : >> { %3035 = vmatmul.f32.vlgmr.msra.gmra.mxu1 %v4189_v12  ;;  %3109 = vmatmul.f32.vlgmr.msrb.gmra.mxu0 %v4232_v45 }
 0x3c0   : >> { %3183 = vmatmul.f32.vlgmr.msrb.gmra.mxu3 %v4216_v31  ;;  %3227 = vmatpush.msra.mxu1 %v2808_v57 }
 0x3c1   : >> { %3302 = vmatpush.msrb.mxu0 %v2835_v33  ;;  %3373 = vmatpush.msrb.mxu3 %v2808_v57 }
 0x3c2   : >> { %3159 = vmatmul.f32.vlgmr.msrb.gmra.mxu2 %v4204_v27 }
 0x3c3   : >> { %3351 = vmatpush.msrb.mxu2 %v2836_v61 }
 0x3c7   : >> { %3135 = vmatmul.f32.vlgmr.msrb.gmra.mxu1 %v4197_v18  ;;  %3207 = vmatmul.f32.vlgmr.msra.gmra.mxu0 %v4197_v18 }
 0x3c8   : >> { %3325 = vmatpush.msrb.mxu1 %v2808_v57  ;;  %3281 = vmatmul.f32.vlgmr.msra.gmra.mxu3 %v4227_v41 }
 0x3ca   : >> { %3255 = vmatmul.f32.vlgmr.msra.gmra.mxu2 %v4253_v54 }
 0x3cf   : >> { %3229 = vmatmul.f32.vlgmr.msra.gmra.mxu1 %v4197_v18  ;;  %3305 = vmatmul.f32.vlgmr.msrb.gmra.mxu0 %v4235_v46 }
 0x3d0   : >> { %3375 = vmatmul.f32.vlgmr.msrb.gmra.mxu3 %v4227_v41 }
 0x3d2   : >> { %3353 = vmatmul.f32.vlgmr.msrb.gmra.mxu2 %v4227_v41 }
 0x3d7   : >> { %3329 = vmatmul.f32.vlgmr.msrb.gmra.mxu1 %v4242_v49 }
 0x424   : >> { %v2816_v48 = vpop.f32.mrf.mxu0 }
 0x42a   : >> { %v2890_v53 = vpop.f32.mrf.mxu3 }
 0x42c   : >> { %v2842_v56 = vpop.f32.mrf.mxu1  ;;  %v2866_v63 = vpop.f32.mrf.mxu2 }
 0x42d   : >> { %v2914_v8 = vpop.f32.mrf.mxu0  ;;  %v2843_v46 = vadd.f32 %v2842_v56, %v2816_v48 }
 0x42f   : >> { %v2867_v32 = vadd.f32 %v2866_v63, %v2843_v46 }
 0x431   : >> { %v2891_v36 = vadd.f32 %v2890_v53, %v2867_v32 }
 0x433   : >> { %v2988_v9 = vpop.f32.mrf.mxu3  ;;  %v2915_v60 = vadd.f32 %v2914_v8, %v2891_v36 }
 0x434   : >> { %v2936_v12 = vpop.f32.mrf.mxu1 }
 0x435   : >> { %v3012_v26 = vpop.f32.mrf.mxu0  ;;  %v2962_v27 = vpop.f32.mrf.mxu2  ;;  %v2937_v22 = vadd.f32 %v2936_v12, %v2915_v60 }
 0x436   : >> { %v2989_v24 = vadd.f32 %v2988_v9, %v2962_v27 }
 0x438   : >> { %v3013_v39 = vadd.f32 %v3012_v26, %v2989_v24 }
 0x43b   : >> { %v3082_v31 = vpop.f32.mrf.mxu3 }
 0x43c   : >> { %v3036_v45 = vpop.f32.mrf.mxu1 }
 0x43d   : >> { %v3110_v18 = vpop.f32.mrf.mxu0  ;;  %v3060_v54 = vpop.f32.mrf.mxu2  ;;  %v3037_v49 = vadd.f32 %v3036_v45, %v3013_v39 }
 0x43f   : >> { %v3061_v19 = vadd.f32 %v3060_v54, %v3037_v49 }
 0x441   : >> { %v3083_v14 = vadd.f32 %v3082_v31, %v3061_v19 }
 0x443   : >> { %v3184_v41 = vpop.f32.mrf.mxu3  ;;  %v3085_v5 = vsel %vm4088_vm0, %v3083_v14, %v2937_v22 }
 0x444   : >> { %v3136_v43 = vpop.f32.mrf.mxu1  ;;  %v3086_v20 = vadd.f32 %v3085_v5, %v4618_v4 }
 0x445   : >> { %v3160_v25 = vpop.f32.mrf.mxu2  ;;  %v3208_v59 = vpop.f32.mrf.mxu0  ;;  %v3137_v29 = vadd.f32 %v3136_v43, %v3110_v18 }
 0x446   : >> { %v3409_v40 = vrot.slane %v3086_v20, 1  ;;  %v3410_v51 = vrot.slane %v3086_v20, 2  ;;  %v3411_v30 = vrot.slane %v3086_v20, 3  ;;  %v3456_v10 = vperm.slane %v3086_v20, 0 }
 0x447   : >> { %v3161_v35 = vadd.f32 %v3160_v25, %v3137_v29 }
 0x448   : >> { %v3457_v57 = vperm.slane %v3409_v40, 0  ;;  %v3458_v33 = vperm.slane %v3410_v51, 0  ;;  %v3459_v61 = vperm.slane %v3411_v30, 0  ;;  %v3497_v56 = vsel %vm3496_vm11, %v4469_v52, %v3456_v10 }
 0x449   : >> { %v3185_v6 = vadd.f32 %v3184_v41, %v3161_v35 }
 0x44a   : >> { %v3498_v26 = vsel %vm3496_vm11, %v4472_v55, %v3457_v57  ;;  %v3499_v27 = vsel %vm3496_vm11, %v4475_v50, %v3458_v33  ;;  %v3500_v31 = vsel %vm3496_vm11, %v4478_v62, %v3459_v61 }
 0x44b   : >> { %v3282_v21 = vpop.f32.mrf.mxu3  ;;  %v3209_v47 = vadd.f32 %v3208_v59, %v3185_v6 }
 0x44c   : >> { %v3230_v38 = vpop.f32.mrf.mxu1 }
 0x44d   : >> { %v3256_v44 = vpop.f32.mrf.mxu2  ;;  %v3306_v3 = vpop.f32.mrf.mxu0  ;;  %v3231_v37 = vadd.f32 %v3230_v38, %v3209_v47 }
 0x44e   : >> { %v3283_v1 = vadd.f32 %v3282_v21, %v3256_v44 }
 0x450   : >> { %v3307_v13 = vadd.f32 %v3306_v3, %v3283_v1 }
 0x453   : >> { %v3376_v11 = vpop.f32.mrf.mxu3 }
 0x454   : >> { %v3330_v58 = vpop.f32.mrf.mxu1 }
 0x455   : >> { %v3331_v15 = vadd.f32 %v3330_v58, %v3307_v13  ;;  %v3354_v34 = vpop.f32.mrf.mxu2 }
 0x457   : >> { %v3355_v2 = vadd.f32 %v3354_v34, %v3331_v15 }
 0x459   : >> { %v3377_v0 = vadd.f32 %v3376_v11, %v3355_v2 }
 0x45b   : >> { %v3379_v7 = vsel %vm4088_vm0, %v3377_v0, %v3231_v37 }
 0x45c   : >> { %v3380_v28 = vadd.f32 %v3379_v7, %v4617_v42 }
 0x45e   : >> { %v3413_v17 = vrot.slane %v3380_v28, 1  ;;  %v3414_v23 = vrot.slane %v3380_v28, 2  ;;  %v3415_v48 = vrot.slane %v3380_v28, 3  ;;  %v3464_v53 = vperm.slane %v3380_v28, 0 }
 0x460   : >> { %v3465_v63 = vperm.slane %v3413_v17, 0  ;;  %v3466_v8 = vperm.slane %v3414_v23, 0  ;;  %v3467_v9 = vperm.slane %v3415_v48, 0  ;;  %v3502_v12 = vsel %vm3501_vm12, %v3497_v56, %v3464_v53 }
 0x461   : >> { %3509 = vst.msk [vmem:[%s3507_s7] sm:$0xff] %vm3508_vm13, %v3502_v12  ;;  %289 = sbr.rel (!%p287_p3) target bundleno = 174 (0xae), region = 98 }
 0x462   : >> { %v3503_v45 = vsel %vm3501_vm12, %v3498_v26, %v3465_v63  ;;  %v3504_v52 = vsel %vm3501_vm12, %v3499_v27, %v3466_v8  ;;  %v3505_v18 = vsel %vm3501_vm12, %v3500_v31, %v3467_v9 }
 0x463   : >> { %3510 = vst.msk [vmem:[%s3507_s7 + $0x10] sm:$0xff] %vm3508_vm13, %v3503_v45 }
 0x464   : >> { %3511 = vst.msk [vmem:[%s3507_s7 + $0x20] sm:$0xff] %vm3508_vm13, %v3504_v52 }
 0x465   : >> { %3512 = vst.msk [vmem:[%s3507_s7 + $0x30] sm:$0xff] %vm3508_vm13, %v3505_v18 }
 0x466   : > { %s3689_s26 = sshll.u32 %s3887_s18, 1  ;;  %s3690_s29 = sshll.u32 %s3891_s19, 4 }
 0x467   : > { %s3525_s25 = sadd.s32 %s3690_s29, %s3689_s26  ;;  %s3538_s9 = sshll.u32 %s4100_s30, 4  ;;  %s3539_s9 = int_to_ptr.vmem [resolvable:$true] %s3538_s9 }
 0x468   : > { %s3691_s10 = sshll.u32 %s3525_s25, 3  ;;  %s3913_s23 = smov 256  }
 0x469   : > { %s3527_s12 = scalar_lea.hbm %s4585_s4, %s3691_s10  ;;  %3696 = sst [smem:[#allocation7]] (%p4010_p9), %s3913_s23 }
 0x46a   : > { %s3540_s11 = sshll.u32 %s3527_s12, 4  ;;  %s3914_s24 = smov 512   ;;  %s3541_s11 = int_to_ptr.hbm [resolvable:$true] %s3540_s11 }
 0x46b   : > { %3697 = sst [smem:[#allocation7 + $0x1]] (%p4010_p9), %s3914_s24  ;;  %s3915_s18 = smov 2  }
 0x46c   : > { %3698 = sst [smem:[#allocation7 + $0x2]] (%p4010_p9), %s3915_s18  ;;  %s3916_s19 = smov 128  }
 0x46d   : > { %3699 = sst [smem:[#allocation7 + $0x3]] (%p4010_p9), %s3916_s19  ;;  %s3917_s30 = smov 8  }
 0x46e   : > { %3700 = sst [smem:[#allocation7 + $0x4]] (%p4010_p9), %s3916_s19  ;;  %s3918_s17 = smov [#allocation6]  }
 0x46f   : > { %3701 = sst [smem:[#allocation7 + $0x5]] (%p4010_p9), %s3917_s30  ;;  %s3919_s28 = smov 0  }
 0x470   : > { %3702 = dma.general (%p4010_p9), %s3539_s9, 1024, %s3541_s11, %s3514_s27, %s3918_s17, [#allocation7], %s3919_s28, 0  }
 0x471 PF: > { %p3713_p5 = scmp.ge.s32.totalorder %s3903_s22, 2  ;;  %s3568_s6 = sand.u32 1, %s3875_s15  }
 0x472   : > { %s3569_s7 = scalar_lea.sflag [#allocation4], %s3568_s6 }
 0x473   : > { %p3709_p6 = pnand %p3713_p5, %p4016_p12 }
 0x475   : > { %p3710_p7 = pneg %p3709_p6 }
 0x477   : > { %3870 = dma.done.wait (%p3710_p7), %s3569_s7, 1024  }
 0x478   : > { %3872 = vsyncadd (%p3710_p7), %s3569_s7, 4294966272  ;;  %s20_s22 = sadd.s32 1, %s3903_s22   ;;  %s4619_s26 = sld [smem:[#allocation10_spill]] }
 0x479   : > { %p17_p8 = scmp.ge.s32.totalorder %s20_s22, 6   ;;  %s4620_s17 = sld [smem:[#allocation13_spill]] }
 0x47a   : > { %s4621_s5 = sld [smem:[#allocation11_spill]]  ;;  %s4623_s15 = smov %s3879_s16 }
 0x47b   : > { %s4622_s27 = sld [smem:[#allocation12_spill]]  ;;  %s4625_s18 = smov %s3895_s20 }
 0x47c   : > { %s4626_s19 = smov %s3899_s21 }
 0x47d   :  { %19 = sbr.rel (!%p17_p8) target bundleno = 7 (0x7), region = 109 }
 0x47e   : > { %s4624_s16 = smov %s4619_s26 }
 0x480   : > { %s4627_s20 = smov %s4621_s5 }
 0x481   : > { %s4628_s21 = smov %s4622_s27 }
 0x482   :  { %3575 = vsyncpa [#allocation3], 1 }
 0x483   :  { %3577 = vsyncpa [#allocation3 + $0x1], 1 }
 0x484   :  { %3578 = vsyncpa [#allocation4], 1 }
 0x485   :  { %3580 = vsyncpa [#allocation4 + $0x1], 1 }

</bundles_post_ra>
